<compile_context>
chip_gen: v5e
topology: v5e:2x2
jax: 0.10.0
libtpu: 0.0.40
codegen_flags: <defaults>
</compile_context>

<pallas_src>
import functools
import math

import jax
import jax.numpy as jnp
from jax import lax
from jax.experimental import pallas as pl
from jax.experimental.pallas import tpu as pltpu

_LANE = 128          # vreg lane width
_MXU = 256           # v6e/v7x MXUs are 2x256x256 -> pad K/N feature dims to 256 granularity
_BF16_SUBLANE = 16   # a bf16 vreg holds (16, 128) -> round row tiles to 16


def _round_up(x, m):
    return ((x + m - 1) // m) * m


def _vmem_capacity_bytes():
    """Best-effort physical VMEM size; conservative 64 MiB fallback (v7x floor)."""
    try:
        return int(pltpu.get_tpu_info().vmem_capacity_bytes)
    except Exception:
        return 64 * 1024 * 1024


def _gelu(h, approximate):
    if approximate:
        # tanh-approx GELU routes through the EUP slot (near-free next to the MXU);
        # recommended default on v5e where the erf polynomial can saturate the VALU slot.
        return jax.nn.gelu(h, approximate=True)
    # Exact erf GELU == torch nn.GELU() default.
    return 0.5 * h * (1.0 + lax.erf(h * (1.0 / math.sqrt(2.0))))


# ---------------------------------------------------------------------------
# Kernels
# ---------------------------------------------------------------------------

def _mlp_resident_kernel(x_ref, w1t_ref, b1_ref, w2t_ref, b2_ref, o_ref,
                         *, approximate_gelu: bool):
    """Fast path: both weight matrices fully VMEM-resident, grid = (row_tiles,)."""
    h = jnp.dot(x_ref[...], w1t_ref[...], preferred_element_type=jnp.float32)
    h = _gelu(h + b1_ref[...].astype(jnp.float32), approximate_gelu)
    # drop1 = Dropout(p=0.0) -> identity.
    out = jnp.dot(h.astype(w2t_ref.dtype), w2t_ref[...],
                  preferred_element_type=jnp.float32)
    # drop2 = Dropout(p=0.0) -> identity.
    o_ref[...] = (out + b2_ref[...].astype(jnp.float32)).astype(o_ref.dtype)


def _mlp_streamed_kernel(x_ref, w1t_ref, b1_ref, w2t_ref, b2_ref, o_ref, acc_ref,
                         *, approximate_gelu: bool):
    """Streamed path: grid = (row_tiles, out_tiles, hidden_tiles[reduction, innermost])."""
    ht = pl.program_id(2)

    @pl.when(ht == 0)
    def _init():
        acc_ref[...] = jnp.zeros_like(acc_ref)

    h = jnp.dot(x_ref[...], w1t_ref[...], preferred_element_type=jnp.float32)
    h = _gelu(h + b1_ref[...].astype(jnp.float32), approximate_gelu)
    # drop1 = Dropout(p=0.0) -> identity.
    # TODO(synk): non-zero dropout would need pltpu.prng_seed / prng_random_bits masking.

    acc_ref[...] += jnp.dot(h.astype(w2t_ref.dtype), w2t_ref[...],
                            preferred_element_type=jnp.float32)

    @pl.when(ht == pl.num_programs(2) - 1)
    def _finalize():
        # drop2 = Dropout(p=0.0) -> identity.
        o_ref[...] = (acc_ref[...] + b2_ref[...].astype(jnp.float32)).astype(o_ref.dtype)


# ---------------------------------------------------------------------------
# Parameter prep (one-time, outside the hot path)
# ---------------------------------------------------------------------------

def prepare_mlp_params(w1, b1, w2, b2, compute_dtype=jnp.bfloat16,
                       feature_multiple=_MXU, hidden_multiple=512):
    """Transpose to [in,hid]/[hid,out], zero-pad feature dims to 256 and hidden to 512
    (full MXU width / stable hidden tiling), cast matmul operands to the MXU compute dtype,
    keep biases in f32. Zero-padding is numerically exact (padded rows/cols contribute 0)."""
    hidden, in_f = w1.shape            # torch Linear: W1 is [hidden, in]
    out_f, hidden2 = w2.shape          # torch Linear: W2 is [out, hidden]
    assert hidden2 == hidden

    in_p = _round_up(in_f, feature_multiple)
    hid_p = _round_up(hidden, hidden_multiple)
    out_p = _round_up(out_f, feature_multiple)

    w1t = jnp.pad(jnp.transpose(w1).astype(compute_dtype),
                  ((0, in_p - in_f), (0, hid_p - hidden)))        # [in_p, hid_p]
    w2t = jnp.pad(jnp.transpose(w2).astype(compute_dtype),
                  ((0, hid_p - hidden), (0, out_p - out_f)))      # [hid_p, out_p]
    b1p = jnp.pad(b1.astype(jnp.float32).reshape(1, hidden),
                  ((0, 0), (0, hid_p - hidden)))                  # [1, hid_p]
    b2p = jnp.pad(b2.astype(jnp.float32).reshape(1, out_f),
                  ((0, 0), (0, out_p - out_f)))                   # [1, out_p]

    # TODO(synk): if fc2.weight is literally fc1.weight.T (tied "weight sharing"), a single
    # resident padded copy could serve both matmuls via dot_general on the other contraction
    # axis; the module does not enforce tying, so w1/w2 are treated as independent here.

    return {
        "w1t": w1t, "b1": b1p, "w2t": w2t, "b2": b2p,
        "in_features": in_f, "hidden": hidden, "out_features": out_f,
        "compute_dtype": compute_dtype,
    }


# ---------------------------------------------------------------------------
# Forward
# ---------------------------------------------------------------------------

def mlp_forward(x, params, *, block_m=None, block_h=512, block_out=2048,
                approximate_gelu=False):
    """x: [..., in_features]. params from prepare_mlp_params. Returns [..., out_features]."""
    in_f = params["in_features"]
    out_f = params["out_features"]
    w1t, b1, w2t, b2 = params["w1t"], params["b1"], params["w2t"], params["b2"]
    compute_dtype = params["compute_dtype"]
    in_p, hid_p = w1t.shape
    out_p = w2t.shape[1]

    orig_shape = x.shape
    xm = x.reshape(-1, in_f)
    m = xm.shape[0]
    out_itemsize = jnp.dtype(x.dtype).itemsize

    # Per-chip budgets.
    vmem_cap = _vmem_capacity_bytes()
    vmem_limit = int(0.62 * vmem_cap)          # ~79 MiB on 128-MiB chips, ~40 MiB on v7x
    big_vmem = vmem_cap >= 96 * 1024 * 1024    # v5e / v6e

    if block_m is None:
        block_m_fast = 256
        # Streamed-weight path: AI ~ tm FLOP/byte; v6e needs ~650 -> tm=512 there.
        block_m_stream = 512 if big_vmem else 256
    else:
        block_m_fast = block_m_stream = block_m

    # --- decide resident vs streamed weights -------------------------------
    tm_fast = min(block_m_fast, _round_up(m, _BF16_SUBLANE))
    weights_bytes = (in_p * hid_p + hid_p * out_p) * 2          # bf16
    resident_footprint = (2 * weights_bytes                      # conservative: double-buffered
                          + 2 * tm_fast * in_p * 2               # x tiles (bf16, 2 bufs)
                          + 2 * tm_fast * out_p * out_itemsize   # out tiles (2 bufs)
                          + 4 * (hid_p + out_p) * 4)             # biases (f32)
    use_resident = resident_footprint <= int(0.85 * vmem_limit)

    kernel_compiler_common = dict(vmem_limit_bytes=vmem_limit)

    if use_resident:
        # ---------------- FAST PATH: weights VMEM-resident ------------------
        tm = tm_fast
        # Ensure >= 2 "parallel" row tiles so v7x's 2 TensorCores both get work.
        if m > _BF16_SUBLANE and _round_up(m, tm) // tm < 2:
            tm = max(_BF16_SUBLANE, _round_up(-(-m // 2), _BF16_SUBLANE))
        m_pad = _round_up(m, tm)

        xp = jnp.pad(xm.astype(compute_dtype), ((0, m_pad - m), (0, in_p - in_f)))

        kernel = functools.partial(_mlp_resident_kernel, approximate_gelu=approximate_gelu)
        out = pl.pallas_call(
            kernel,
            out_shape=jax.ShapeDtypeStruct((m_pad, out_p), x.dtype),
            grid=(m_pad // tm,),
            in_specs=[
                pl.BlockSpec((tm, in_p), lambda i: (i, 0)),      # x rows (pipelined over i)
                pl.BlockSpec((in_p, hid_p), lambda i: (0, 0)),   # W1^T  (grid-invariant -> resident)
                pl.BlockSpec((1, hid_p), lambda i: (0, 0)),      # b1    (resident)
                pl.BlockSpec((hid_p, out_p), lambda i: (0, 0)),  # W2^T  (resident)
                pl.BlockSpec((1, out_p), lambda i: (0, 0)),      # b2    (resident)
            ],
            out_specs=pl.BlockSpec((tm, out_p), lambda i: (i, 0)),
            compiler_params=pltpu.CompilerParams(
                dimension_semantics=("parallel",),
                **kernel_compiler_common,
            ),
        )(xp, w1t, b1, w2t, b2)
    else:
        # ---------------- STREAMED PATH: large hidden / out ----------------
        tm = min(block_m_stream, _round_up(m, _BF16_SUBLANE))
        m_pad = _round_up(m, tm)

        # Hidden tile: largest multiple-of-256 divisor of hid_p not exceeding block_h
        # (hid_p is padded to a multiple of 512, so th=512 is always available at block_h=512).
        th = _MXU
        top = (min(block_h, hid_p) // _MXU) * _MXU
        for cand in range(top, _MXU - 1, -_MXU):
            if hid_p % cand == 0:
                th = cand
                break

        # Out tile: keep the f32 accumulator and W2^T tiles inside the VMEM budget.
        if out_p <= block_out:
            tn = out_p
        else:
            tn = _MXU
            topn = (block_out // _MXU) * _MXU
            for cand in range(topn, _MXU - 1, -_MXU):
                if out_p % cand == 0:
                    tn = cand
                    break

        xp = jnp.pad(xm.astype(compute_dtype), ((0, m_pad - m), (0, in_p - in_f)))

        grid = (m_pad // tm, out_p // tn, hid_p // th)
        kernel = functools.partial(_mlp_streamed_kernel, approximate_gelu=approximate_gelu)
        out = pl.pallas_call(
            kernel,
            out_shape=jax.ShapeDtypeStruct((m_pad, out_p), x.dtype),
            grid=grid,
            in_specs=[
                pl.BlockSpec((tm, in_p), lambda i, j, ht: (i, 0)),    # x rows
                pl.BlockSpec((in_p, th), lambda i, j, ht: (0, ht)),   # W1^T hidden tile
                pl.BlockSpec((1, th), lambda i, j, ht: (0, ht)),      # b1 hidden tile
                pl.BlockSpec((th, tn), lambda i, j, ht: (ht, j)),     # W2^T (hidden, out) tile
                pl.BlockSpec((1, tn), lambda i, j, ht: (0, j)),       # b2 out tile
            ],
            out_specs=pl.BlockSpec((tm, tn), lambda i, j, ht: (i, j)),
            scratch_shapes=[pltpu.VMEM((tm, tn), jnp.float32)],
            compiler_params=pltpu.CompilerParams(
                dimension_semantics=("parallel", "parallel", "arbitrary"),
                **kernel_compiler_common,
            ),
        )(xp, w1t, b1, w2t, b2)

    out = out[:m, :out_f]
    return out.reshape(*orig_shape[:-1], out_f)


# ---------------------------------------------------------------------------
# Self-test
# ---------------------------------------------------------------------------

if __name__ == "__main__":
    # Small shapes implied by the module: Linear layers over the last dim.
    batch, seq = 2, 8
    in_features, hidden, out_features = 32, 64, 32

    key = jax.random.PRNGKey(0)
    kx, kw1, kb1, kw2, kb2 = jax.random.split(key, 5)

    x = jax.random.normal(kx, (batch, seq, in_features), dtype=jnp.float32)

    # torch-Linear-style params: W is [out, in], b is [out].
    bound1 = 1.0 / math.sqrt(in_features)
    w1 = jax.random.uniform(kw1, (hidden, in_features), minval=-bound1, maxval=bound1,
                            dtype=jnp.float32)
    b1 = jax.random.uniform(kb1, (hidden,), minval=-bound1, maxval=bound1, dtype=jnp.float32)

    bound2 = 1.0 / math.sqrt(hidden)
    w2 = jax.random.uniform(kw2, (out_features, hidden), minval=-bound2, maxval=bound2,
                            dtype=jnp.float32)
    b2 = jax.random.uniform(kb2, (out_features,), minval=-bound2, maxval=bound2,
                            dtype=jnp.float32)

    params = prepare_mlp_params(w1, b1, w2, b2)   # one-time prep, outside the hot path
    y = mlp_forward(x, params)                    # exact-erf GELU (torch nn.GELU() default)
    y = jax.block_until_ready(y)

    # Reference (exact GELU, f32) matching torch semantics. Kernel uses bf16 MXU operands
    # with f32 accumulation, so tolerance is loosened accordingly.
    h_ref = x @ w1.T + b1
    h_ref = 0.5 * h_ref * (1.0 + lax.erf(h_ref / math.sqrt(2.0)))
    y_ref = h_ref @ w2.T + b2

    assert y.shape == (batch, seq, out_features)
    assert jnp.allclose(y, y_ref, atol=2e-2, rtol=2e-2), float(jnp.max(jnp.abs(y - y_ref)))

    print("KERNEL_OK")
</pallas_src>

<mosaic_0001>
module attributes {stable_mosaic.version = 11 : i64} {
  func.func @_mlp_resident_kernel(%arg0: i32, %arg1: memref<16x256xbf16, #tpu.memory_space<vmem>>, %arg2: memref<256x512xbf16, #tpu.memory_space<vmem>>, %arg3: memref<1x512xf32, #tpu.memory_space<vmem>>, %arg4: memref<512x256xbf16, #tpu.memory_space<vmem>>, %arg5: memref<1x256xf32, #tpu.memory_space<vmem>>, %arg6: memref<16x256xf32, #tpu.memory_space<vmem>>) attributes {dimension_semantics = [#tpu.dimension_semantics<parallel>], iteration_bounds = array<i64: 1>, scalar_prefetch = 0 : i64, scratch_operands = 0 : i64, tpu.core_type = #tpu.core_type<tc>, window_params = [{transform_indices = @transform_0, window_bounds = array<i64: 16, 256>}, {pipeline_mode = #tpu.pipeline_mode<synchronous>, transform_indices = @transform_1, window_bounds = array<i64: 256, 512>}, {pipeline_mode = #tpu.pipeline_mode<synchronous>, transform_indices = @transform_2, window_bounds = array<i64: 1, 512>}, {pipeline_mode = #tpu.pipeline_mode<synchronous>, transform_indices = @transform_3, window_bounds = array<i64: 512, 256>}, {pipeline_mode = #tpu.pipeline_mode<synchronous>, transform_indices = @transform_4, window_bounds = array<i64: 1, 256>}, {transform_indices = @transform_5, window_bounds = array<i64: 16, 256>}]} {
    %c0 = arith.constant 0 : index
    %c0_0 = arith.constant 0 : index
    %0 = vector.load %arg1[%c0, %c0_0] : memref<16x256xbf16, #tpu.memory_space<vmem>>, vector<16x256xbf16>
    %c0_1 = arith.constant 0 : index
    %c0_2 = arith.constant 0 : index
    %1 = vector.load %arg2[%c0_1, %c0_2] : memref<256x512xbf16, #tpu.memory_space<vmem>>, vector<256x512xbf16>
    %cst = arith.constant dense<0.000000e+00> : vector<16x512xf32>
    %2 = tpu.matmul %0, %1, %cst {dimension_numbers = #tpu.dot_dimension_numbers<[1], [0], [0], [1], [0, 0, 1, 1], [], []>} : vector<16x256xbf16>, vector<256x512xbf16>, vector<16x512xf32> -> vector<16x512xf32>
    %c0_3 = arith.constant 0 : index
    %c0_4 = arith.constant 0 : index
    %3 = vector.load %arg3[%c0_3, %c0_4] : memref<1x512xf32, #tpu.memory_space<vmem>>, vector<1x512xf32>
    %4 = vector.broadcast %3 : vector<1x512xf32> to vector<16x512xf32>
    %5 = arith.addf %2, %4 : vector<16x512xf32>
    %cst_5 = arith.constant 5.000000e-01 : f32
    %6 = vector.broadcast %cst_5 : f32 to vector<16x512xf32>
    %7 = arith.mulf %6, %5 : vector<16x512xf32>
    %cst_6 = arith.constant 0.707106769 : f32
    %8 = vector.broadcast %cst_6 : f32 to vector<16x512xf32>
    %9 = arith.mulf %5, %8 : vector<16x512xf32>
    %10 = math.erf %9 : vector<16x512xf32>
    %cst_7 = arith.constant 1.000000e+00 : f32
    %11 = vector.broadcast %cst_7 : f32 to vector<16x512xf32>
    %12 = arith.addf %11, %10 : vector<16x512xf32>
    %13 = arith.mulf %7, %12 : vector<16x512xf32>
    %14 = arith.truncf %13 : vector<16x512xf32> to vector<16x512xbf16>
    %c0_8 = arith.constant 0 : index
    %c0_9 = arith.constant 0 : index
    %15 = vector.load %arg4[%c0_8, %c0_9] : memref<512x256xbf16, #tpu.memory_space<vmem>>, vector<512x256xbf16>
    %cst_10 = arith.constant dense<0.000000e+00> : vector<16x256xf32>
    %16 = tpu.matmul %14, %15, %cst_10 {dimension_numbers = #tpu.dot_dimension_numbers<[1], [0], [0], [1], [0, 0, 1, 1], [], []>} : vector<16x512xbf16>, vector<512x256xbf16>, vector<16x256xf32> -> vector<16x256xf32>
    %c0_11 = arith.constant 0 : index
    %c0_12 = arith.constant 0 : index
    %17 = vector.load %arg5[%c0_11, %c0_12] : memref<1x256xf32, #tpu.memory_space<vmem>>, vector<1x256xf32>
    %18 = vector.broadcast %17 : vector<1x256xf32> to vector<16x256xf32>
    %19 = arith.addf %16, %18 : vector<16x256xf32>
    %c0_13 = arith.constant 0 : index
    %c0_14 = arith.constant 0 : index
    %20 = vector.load %arg6[%c0_13, %c0_14] : memref<16x256xf32, #tpu.memory_space<vmem>>, vector<16x256xf32>
    tpu.vector_store %arg6[%c0_13, %c0_14], %19 {strides = array<i32>} : memref<16x256xf32, #tpu.memory_space<vmem>>, vector<16x256xf32>,
    return
  }
  func.func @transform_0(%arg0: i32) -> (i32, i32) {
    %c0_i32 = arith.constant 0 : i32
    %c0_i32_0 = arith.constant 0 : i32
    return %arg0, %c0_i32 : i32, i32
  }
  func.func @transform_1(%arg0: i32) -> (i32, i32) {
    %c0_i32 = arith.constant 0 : i32
    %c0_i32_0 = arith.constant 0 : i32
    %c0_i32_1 = arith.constant 0 : i32
    return %c0_i32, %c0_i32_0 : i32, i32
  }
  func.func @transform_2(%arg0: i32) -> (i32, i32) {
    %c0_i32 = arith.constant 0 : i32
    %c0_i32_0 = arith.constant 0 : i32
    %c0_i32_1 = arith.constant 0 : i32
    return %c0_i32, %c0_i32_0 : i32, i32
  }
  func.func @transform_3(%arg0: i32) -> (i32, i32) {
    %c0_i32 = arith.constant 0 : i32
    %c0_i32_0 = arith.constant 0 : i32
    %c0_i32_1 = arith.constant 0 : i32
    return %c0_i32, %c0_i32_0 : i32, i32
  }
  func.func @transform_4(%arg0: i32) -> (i32, i32) {
    %c0_i32 = arith.constant 0 : i32
    %c0_i32_0 = arith.constant 0 : i32
    %c0_i32_1 = arith.constant 0 : i32
    return %c0_i32, %c0_i32_0 : i32, i32
  }
  func.func @transform_5(%arg0: i32) -> (i32, i32) {
    %c0_i32 = arith.constant 0 : i32
    %c0_i32_0 = arith.constant 0 : i32
    return %arg0, %c0_i32 : i32, i32
  }
}

</mosaic_0001>

<bundles_post_ra>
// kernel: tpu_custom_call.1
= control target key start
LH: loop header
LB: loop body
LE: loop exit
PB: predicated region body
PF: predicated region fallthrough
CT: control target
= control target key end

     0   :  { %10 = vsyncpa [#allocation3], 0  ;;  %s2766_s0 = inlined_call_operand.hbm [shape: bf16[16,256], index: 0, kind: input, shape index: {}]   ;;  %s2767_s1 = inlined_call_operand.hbm [shape: bf16[256,512], index: 1, kind: input, shape index: {}]   ;;  %s2768_s2 = inlined_call_operand.hbm [shape: f32[1,512], index: 2, kind: input, shape index: {}]   ;;  %s2769_s3 = inlined_call_operand.hbm [shape: bf16[512,256], index: 3, kind: input, shape index: {}]   ;;  %s2770_s4 = inlined_call_operand.vmem [shape: f32[1,256], index: 4, kind: input, shape index: {}]   ;;  %s2771_s5 = inlined_call_operand.hbm [shape: f32[16,256], index: 5, kind: output, shape index: {}]  }
   0x1   :  { %11 = vsyncpa [#allocation6], 0 }
   0x2   :  { %12 = vsyncpa [#allocation9], 0  ;;  %s31_s20 = sshll.u32 %s2767_s1, 4  ;;  %s32_s20 = int_to_ptr.hbm [resolvable:$true] %s31_s20 }
   0x3   :  { %13 = vsyncpa [#allocation4], 0  ;;  %s2294_s21 = smov [#allocation5]   ;;  %s18_s25 = sshll.u32 %s2766_s0, 4  ;;  %s19_s25 = int_to_ptr.hbm [resolvable:$true] %s18_s25 }
   0x4   :  { %s33_s22 = sshll.u32 %s2294_s21, 4  ;;  %s2295_s26 = smov 256   ;;  %s34_s22 = int_to_ptr.vmem [resolvable:$true] %s33_s22 }
   0x5   :  { %s2296_s27 = smov 16   ;;  %s2297_s28 = smov [#allocation2]  }
   0x6   :  { %39 = dma.hbm_to_vmem [thread:$0]  %s32_s20, 8192, %s34_s22, [#allocation6], %s2295_s26, %s2295_s26, %s2296_s27  }
   0x7   :  { %s20_s29 = sshll.u32 %s2297_s28, 4  ;;  %s2298_s1 = smov 128   ;;  %s21_s29 = int_to_ptr.vmem [resolvable:$true] %s20_s29 }
   0x8   :  { %s2299_s30 = smov 8   ;;  %s45_s8 = sshll.u32 %s2768_s2, 4  ;;  %s46_s8 = int_to_ptr.hbm [resolvable:$true] %s45_s8 }
   0x9   :  { %26 = dma.hbm_to_vmem [thread:$0]  %s19_s25, 256, %s21_s29, [#allocation3], %s2298_s1, %s2298_s1, %s2299_s30  }
   0xa   :  { %s2300_s9 = smov [#allocation7]   ;;  %s55_s12 = sshll.u32 %s2769_s3, 4  ;;  %s56_s12 = int_to_ptr.hbm [resolvable:$true] %s55_s12 }
   0xb   :  { %s47_s0 = sshll.u32 %s2300_s9, 4  ;;  %s2301_s13 = smov [#allocation8]   ;;  %s48_s0 = int_to_ptr.vmem [resolvable:$true] %s47_s0 }
   0xc   :  { %50 = dma.hbm_to_vmem [thread:$0]  %s46_s8, 64, %s48_s0, [#allocation6]  }
   0xd   :  { %s57_s14 = sshll.u32 %s2301_s13, 4  ;;  %s58_s14 = int_to_ptr.vmem [resolvable:$true] %s57_s14 }
   0xe   :  { %63 = dma.hbm_to_vmem [thread:$0]  %s56_s12, 8192, %s58_s14, [#allocation9], %s2298_s1, %s2298_s1, %s2299_s30  }
   0xf   :  { %2286 = dma.done.wait [#allocation3], 256  }
  0x10   :  { %2287 = vsyncadd [#allocation3], 4294967040 }
  0x11   :  { %2288 = dma.done.wait [#allocation6], 8256  }
  0x12   :  { %2289 = vsyncadd [#allocation6], 4294959040 }
  0x13   :  { %2290 = dma.done.wait [#allocation9], 8192  }
  0x14   :  { %2291 = vsyncadd [#allocation9], 4294959104  ;;  %v1605_v0 = vld [vmem:[#allocation5 + $0xe0] sm:$0xf]  ;;  %v2043_v1 = vld [vmem:[#allocation5 + $0xec] sm:$0xf0] }
  0x15   :  { %v1733_v2 = vld [vmem:[#allocation5 + $0x1e0] sm:$0xf]  ;;  %v1606_v3 = vor.u32 %v2043_v1, %v1605_v0  ;;  %v2075_v4 = vld [vmem:[#allocation5 + $0x1ec] sm:$0xf0]  ;;  %v2041_v5 = vld [vmem:[#allocation5 + $0xe4] sm:$0xf] }
  0x16   :  { %v1607_v6 = vld [vmem:[#allocation5 + $0xf0] sm:$0xf0]  ;;  %v1734_v7 = vor.u32 %v2075_v4, %v1733_v2  ;;  %v2073_v9 = vld [vmem:[#allocation5 + $0x1e4] sm:$0xf]  ;;  %v1589_v11 = vld [vmem:[#allocation5 + $0xc0] sm:$0xf] }
  0x17   :  { %v1610_v8 = vor.u32 %v2041_v5, %v1607_v6  ;;  %v1735_v10 = vld [vmem:[#allocation5 + $0x1f0] sm:$0xf0]  ;;  %488 = vmatpush.bf16.msra.mxu0 %v1606_v3  ;;  %v2039_v13 = vld [vmem:[#allocation5 + $0xcc] sm:$0xf0]  ;;  %v1717_v14 = vld [vmem:[#allocation5 + $0x1c0] sm:$0xf] }
  0x18   :  { %v1738_v12 = vor.u32 %v2073_v9, %v1735_v10  ;;  %v2071_v15 = vld [vmem:[#allocation5 + $0x1cc] sm:$0xf0]  ;;  %502 = vmatpush.bf16.msra.mxu1 %v1734_v7  ;;  %v1590_v16 = vor.u32 %v2039_v13, %v1589_v11  ;;  %v2037_v18 = vld [vmem:[#allocation5 + $0xc4] sm:$0xf]  ;;  %v1591_v19 = vld [vmem:[#allocation5 + $0xd0] sm:$0xf0] }
  0x19   :  { %516 = vmatpush.bf16.msra.mxu2 %v1610_v8  ;;  %v1718_v17 = vor.u32 %v2071_v15, %v1717_v14  ;;  %v2069_v20 = vld [vmem:[#allocation5 + $0x1c4] sm:$0xf]  ;;  %v1594_v21 = vor.u32 %v2037_v18, %v1591_v19  ;;  %v1719_v22 = vld [vmem:[#allocation5 + $0x1d0] sm:$0xf0]  ;;  %v1573_v23 = vld [vmem:[#allocation5 + $0xa0] sm:$0xf] }
  0x1a   :  { %530 = vmatpush.bf16.msra.mxu3 %v1738_v12  ;;  %v2035_v24 = vld [vmem:[#allocation5 + $0xac] sm:$0xf0]  ;;  %v1722_v25 = vor.u32 %v2069_v20, %v1719_v22  ;;  %v1701_v26 = vld [vmem:[#allocation5 + $0x1a0] sm:$0xf]  ;;  %v2033_v28 = vld [vmem:[#allocation5 + $0xa4] sm:$0xf] }
  0x1b   :  { %v2067_v27 = vld [vmem:[#allocation5 + $0x1ac] sm:$0xf0]  ;;  %489 = vmatpush.bf16.msra.mxu0 %v1590_v16  ;;  %v1574_v29 = vor.u32 %v2035_v24, %v1573_v23  ;;  %v1575_v30 = vld [vmem:[#allocation5 + $0xb0] sm:$0xf0]  ;;  %v2065_v31 = vld [vmem:[#allocation5 + $0x1a4] sm:$0xf] }
  0x1c   :  { %v1703_v32 = vld [vmem:[#allocation5 + $0x1b0] sm:$0xf0]  ;;  %503 = vmatpush.bf16.msra.mxu1 %v1718_v17  ;;  %v1702_v33 = vor.u32 %v2067_v27, %v1701_v26  ;;  %v1578_v34 = vor.u32 %v2033_v28, %v1575_v30  ;;  %v1557_v35 = vld [vmem:[#allocation5 + $0x80] sm:$0xf]  ;;  %v2031_v36 = vld [vmem:[#allocation5 + $0x8c] sm:$0xf0] }
  0x1d   :  { %517 = vmatpush.bf16.msra.mxu2 %v1594_v21  ;;  %v1685_v37 = vld [vmem:[#allocation5 + $0x180] sm:$0xf]  ;;  %v1706_v38 = vor.u32 %v2065_v31, %v1703_v32  ;;  %v2063_v39 = vld [vmem:[#allocation5 + $0x18c] sm:$0xf0]  ;;  %v2029_v40 = vld [vmem:[#allocation5 + $0x84] sm:$0xf]  ;;  %v1558_v44 = vor.u32 %v2031_v36, %v1557_v35 }
  0x1e   :  { %531 = vmatpush.bf16.msra.mxu3 %v1722_v25  ;;  %v1559_v41 = vld [vmem:[#allocation5 + $0x90] sm:$0xf0]  ;;  %v2061_v42 = vld [vmem:[#allocation5 + $0x184] sm:$0xf]  ;;  %v1686_v45 = vor.u32 %v2063_v39, %v1685_v37  ;;  %v1541_v47 = vld [vmem:[#allocation5 + $0x60] sm:$0xf] }
  0x1f   :  { %v1687_v43 = vld [vmem:[#allocation5 + $0x190] sm:$0xf0]  ;;  %490 = vmatpush.bf16.msra.mxu0 %v1574_v29  ;;  %v1562_v46 = vor.u32 %v2029_v40, %v1559_v41  ;;  %v2027_v48 = vld [vmem:[#allocation5 + $0x6c] sm:$0xf0]  ;;  %v1669_v49 = vld [vmem:[#allocation5 + $0x160] sm:$0xf] }
  0x20   :  { %504 = vmatpush.bf16.msra.mxu1 %v1702_v33  ;;  %v1690_v50 = vor.u32 %v2061_v42, %v1687_v43  ;;  %v2059_v51 = vld [vmem:[#allocation5 + $0x16c] sm:$0xf0]  ;;  %v2025_v52 = vld [vmem:[#allocation5 + $0x64] sm:$0xf]  ;;  %v1543_v53 = vld [vmem:[#allocation5 + $0x70] sm:$0xf0]  ;;  %v1542_v56 = vor.u32 %v2027_v48, %v1541_v47 }
  0x21   :  { %518 = vmatpush.bf16.msra.mxu2 %v1578_v34  ;;  %v2057_v54 = vld [vmem:[#allocation5 + $0x164] sm:$0xf]  ;;  %v1671_v55 = vld [vmem:[#allocation5 + $0x170] sm:$0xf0]  ;;  %v1670_v57 = vor.u32 %v2059_v51, %v1669_v49  ;;  %v1546_v58 = vor.u32 %v2025_v52, %v1543_v53  ;;  %v1525_v59 = vld [vmem:[#allocation5 + $0x40] sm:$0xf] }
  0x22   :  { %532 = vmatpush.bf16.msra.mxu3 %v1706_v38  ;;  %v2023_v60 = vld [vmem:[#allocation5 + $0x4c] sm:$0xf0]  ;;  %v1653_v61 = vld [vmem:[#allocation5 + $0x140] sm:$0xf]  ;;  %v1674_v62 = vor.u32 %v2057_v54, %v1671_v55  ;;  %v2021_v0 = vld [vmem:[#allocation5 + $0x44] sm:$0xf] }
  0x23   :  { %491 = vmatpush.bf16.msra.mxu0 %v1558_v44  ;;  %v2055_v63 = vld [vmem:[#allocation5 + $0x14c] sm:$0xf0]  ;;  %v1527_v1 = vld [vmem:[#allocation5 + $0x50] sm:$0xf0]  ;;  %v2053_v2 = vld [vmem:[#allocation5 + $0x144] sm:$0xf]  ;;  %v1526_v4 = vor.u32 %v2023_v60, %v1525_v59 }
  0x24   :  { %505 = vmatpush.bf16.msra.mxu1 %v1686_v45  ;;  %v1655_v3 = vld [vmem:[#allocation5 + $0x150] sm:$0xf0]  ;;  %v1654_v5 = vor.u32 %v2055_v63, %v1653_v61  ;;  %v1530_v6 = vor.u32 %v2021_v0, %v1527_v1  ;;  %v1509_v7 = vld [vmem:[#allocation5 + $0x20] sm:$0xf]  ;;  %v2019_v8 = vld [vmem:[#allocation5 + $0x2c] sm:$0xf0] }
  0x25   :  { %519 = vmatpush.bf16.msra.mxu2 %v1562_v46  ;;  %v1637_v9 = vld [vmem:[#allocation5 + $0x120] sm:$0xf]  ;;  %v1658_v10 = vor.u32 %v2053_v2, %v1655_v3  ;;  %v2051_v11 = vld [vmem:[#allocation5 + $0x12c] sm:$0xf0]  ;;  %v2017_v12 = vld [vmem:[#allocation5 + $0x24] sm:$0xf]  ;;  %v1510_v16 = vor.u32 %v2019_v8, %v1509_v7 }
  0x26   :  { %533 = vmatpush.bf16.msra.mxu3 %v1690_v50  ;;  %v1511_v13 = vld [vmem:[#allocation5 + $0x30] sm:$0xf0]  ;;  %v2049_v14 = vld [vmem:[#allocation5 + $0x124] sm:$0xf]  ;;  %v1493_v17 = vld [vmem:[#allocation5] sm:$0xf]  ;;  %v1638_v20 = vor.u32 %v2051_v11, %v1637_v9 }
  0x27   :  { %492 = vmatpush.bf16.msra.mxu0 %v1542_v56  ;;  %v1639_v15 = vld [vmem:[#allocation5 + $0x130] sm:$0xf0]  ;;  %v2015_v18 = vld [vmem:[#allocation5 + $0xc] sm:$0xf0]  ;;  %v1621_v19 = vld [vmem:[#allocation5 + $0x100] sm:$0xf]  ;;  %v1514_v21 = vor.u32 %v2017_v12, %v1511_v13 }
  0x28   :  { %506 = vmatpush.bf16.msra.mxu1 %v1670_v57  ;;  %v2047_v22 = vld [vmem:[#allocation5 + $0x10c] sm:$0xf0]  ;;  %v2013_v23 = vld [vmem:[#allocation5 + $0x4] sm:$0xf]  ;;  %v1495_v24 = vld [vmem:[#allocation5 + $0x10] sm:$0xf0]  ;;  %v1642_v25 = vor.u32 %v2049_v14, %v1639_v15  ;;  %v1494_v32 = vor.u32 %v2015_v18, %v1493_v17 }
  0x29   :  { %520 = vmatpush.bf16.msra.mxu2 %v1546_v58  ;;  %v2045_v26 = vld [vmem:[#allocation5 + $0x104] sm:$0xf]  ;;  %v1623_v27 = vld [vmem:[#allocation5 + $0x110] sm:$0xf0]  ;;  %v1613_v28 = vld [vmem:[#allocation5 + $0xe8] sm:$0xf]  ;;  %v1622_v36 = vor.u32 %v2047_v22, %v1621_v19  ;;  %v1498_v37 = vor.u32 %v2013_v23, %v1495_v24 }
  0x2a   :  { %534 = vmatpush.bf16.msra.mxu3 %v1674_v62  ;;  %v2044_v29 = vld [vmem:[#allocation5 + $0xf4] sm:$0xf0]  ;;  %v1741_v30 = vld [vmem:[#allocation5 + $0x1e8] sm:$0xf]  ;;  %v2042_v33 = vld [vmem:[#allocation5 + $0xec] sm:$0xf]  ;;  %v1626_v41 = vor.u32 %v2045_v26, %v1623_v27 }
  0x2b   :  { %493 = vmatpush.bf16.msra.mxu0 %v1526_v4  ;;  %v2076_v31 = vld [vmem:[#allocation5 + $0x1f4] sm:$0xf0]  ;;  %v1615_v34 = vld [vmem:[#allocation5 + $0xf8] sm:$0xf0]  ;;  %v2074_v35 = vld [vmem:[#allocation5 + $0x1ec] sm:$0xf]  ;;  %v1614_v42 = vor.u32 %v2044_v29, %v1613_v28 }
  0x2c   :  { %507 = vmatpush.bf16.msra.mxu1 %v1654_v5  ;;  %v1743_v38 = vld [vmem:[#allocation5 + $0x1f8] sm:$0xf0]  ;;  %v1485_v39 = vld [vmem:[#allocation2] sm:$0xf]  ;;  %v2012_v40 = vld [vmem:[#allocation2 + $0x4] sm:$0xf0]  ;;  %v1742_v45 = vor.u32 %v2076_v31, %v1741_v30  ;;  %v1618_v46 = vor.u32 %v2042_v33, %v1615_v34 }
  0x2d   :  { %521 = vmatpush.bf16.msra.mxu2 %v1530_v6  ;;  %v2011_v43 = vld [vmem:[#allocation2 + $0x4] sm:$0xf]  ;;  %v1487_v44 = vld [vmem:[#allocation2 + $0x8] sm:$0xf0]  ;;  %v1597_v47 = vld [vmem:[#allocation5 + $0xc8] sm:$0xf]  ;;  %v1746_v50 = vor.u32 %v2074_v35, %v1743_v38  ;;  %v2348_v51 = vor.u32 %v2012_v40, %v1485_v39 }
  0x2e   :  { %535 = vmatpush.bf16.msra.mxu3 %v1658_v10  ;;  %v2040_v48 = vld [vmem:[#allocation5 + $0xd4] sm:$0xf0]  ;;  %v1725_v49 = vld [vmem:[#allocation5 + $0x1c8] sm:$0xf]  ;;  %v2038_v53 = vld [vmem:[#allocation5 + $0xcc] sm:$0xf]  ;;  %v2350_v55 = vor.u32 %v2011_v43, %v1487_v44 }
  0x2f   :  { %494 = vmatpush.bf16.msra.mxu0 %v1510_v16  ;;  %v2072_v52 = vld [vmem:[#allocation5 + $0x1d4] sm:$0xf0]  ;;  %v1599_v54 = vld [vmem:[#allocation5 + $0xd8] sm:$0xf0]  ;;  %v2070_v56 = vld [vmem:[#allocation5 + $0x1cc] sm:$0xf]  ;;  %v1598_v58 = vor.u32 %v2040_v48, %v1597_v47 }
  0x30   :  { %508 = vmatpush.bf16.msra.mxu1 %v1638_v20  ;;  %v1727_v57 = vld [vmem:[#allocation5 + $0x1d8] sm:$0xf0]  ;;  %v1726_v59 = vor.u32 %v2072_v52, %v1725_v49  ;;  %v1602_v60 = vor.u32 %v2038_v53, %v1599_v54  ;;  %v1581_v61 = vld [vmem:[#allocation5 + $0xa8] sm:$0xf]  ;;  %v2036_v62 = vld [vmem:[#allocation5 + $0xb4] sm:$0xf0] }
  0x31   :  { %522 = vmatpush.bf16.msra.mxu2 %v1514_v21  ;;  %v1709_v63 = vld [vmem:[#allocation5 + $0x1a8] sm:$0xf]  ;;  %v1730_v0 = vor.u32 %v2070_v56, %v1727_v57  ;;  %v2068_v1 = vld [vmem:[#allocation5 + $0x1b4] sm:$0xf0]  ;;  %v2034_v2 = vld [vmem:[#allocation5 + $0xac] sm:$0xf]  ;;  %v1582_v6 = vor.u32 %v2036_v62, %v1581_v61 }
  0x32   :  { %536 = vmatpush.bf16.msra.mxu3 %v1642_v25  ;;  %v1583_v3 = vld [vmem:[#allocation5 + $0xb8] sm:$0xf0]  ;;  %v2066_v4 = vld [vmem:[#allocation5 + $0x1ac] sm:$0xf]  ;;  %v1710_v7 = vor.u32 %v2068_v1, %v1709_v63  ;;  %v1565_v9 = vld [vmem:[#allocation5 + $0x88] sm:$0xf] }
  0x33   :  { %495 = vmatpush.bf16.msra.mxu0 %v1494_v32  ;;  %v1711_v5 = vld [vmem:[#allocation5 + $0x1b8] sm:$0xf0]  ;;  %v1586_v8 = vor.u32 %v2034_v2, %v1583_v3  ;;  %v2032_v10 = vld [vmem:[#allocation5 + $0x94] sm:$0xf0]  ;;  %v1693_v11 = vld [vmem:[#allocation5 + $0x188] sm:$0xf] }
  0x34   :  { %509 = vmatpush.bf16.msra.mxu1 %v1622_v36  ;;  %v1714_v12 = vor.u32 %v2066_v4, %v1711_v5  ;;  %v2064_v13 = vld [vmem:[#allocation5 + $0x194] sm:$0xf0]  ;;  %v2030_v14 = vld [vmem:[#allocation5 + $0x8c] sm:$0xf]  ;;  %v1567_v15 = vld [vmem:[#allocation5 + $0x98] sm:$0xf0]  ;;  %v1566_v18 = vor.u32 %v2032_v10, %v1565_v9 }
  0x35   :  { %523 = vmatpush.bf16.msra.mxu2 %v1498_v37  ;;  %v2062_v16 = vld [vmem:[#allocation5 + $0x18c] sm:$0xf]  ;;  %v1695_v17 = vld [vmem:[#allocation5 + $0x198] sm:$0xf0]  ;;  %v1694_v19 = vor.u32 %v2064_v13, %v1693_v11  ;;  %v1570_v20 = vor.u32 %v2030_v14, %v1567_v15  ;;  %v1549_v21 = vld [vmem:[#allocation5 + $0x68] sm:$0xf] }
  0x36   :  { %537 = vmatpush.bf16.msra.mxu3 %v1626_v41  ;;  %496 = vmatmul.bf16.vlgmr.msra.gmra.mxu0 %v2348_v51  ;;  %v2028_v22 = vld [vmem:[#allocation5 + $0x74] sm:$0xf0]  ;;  %v1677_v23 = vld [vmem:[#allocation5 + $0x168] sm:$0xf]  ;;  %v1698_v24 = vor.u32 %v2062_v16, %v1695_v17  ;;  %v2026_v26 = vld [vmem:[#allocation5 + $0x6c] sm:$0xf] }
  0x37   :  { %544 = vmatpush.bf16.msrb.mxu0 %v1614_v42  ;;  %510 = vmatmul.bf16.vlgmr.msra.gmra.mxu1 %v2350_v55  ;;  %v2060_v25 = vld [vmem:[#allocation5 + $0x174] sm:$0xf0]  ;;  %v1551_v27 = vld [vmem:[#allocation5 + $0x78] sm:$0xf0]  ;;  %v2058_v28 = vld [vmem:[#allocation5 + $0x16c] sm:$0xf]  ;;  %v1550_v30 = vor.u32 %v2028_v22, %v1549_v21 }
  0x38   :  { %558 = vmatpush.bf16.msrb.mxu1 %v1742_v45  ;;  %524 = vmatmul.bf16.vlgmr.msra.gmra.mxu2 %v2348_v51  ;;  %v1679_v29 = vld [vmem:[#allocation5 + $0x178] sm:$0xf0]  ;;  %v1678_v31 = vor.u32 %v2060_v25, %v1677_v23  ;;  %v1554_v32 = vor.u32 %v2026_v26, %v1551_v27  ;;  %v1533_v33 = vld [vmem:[#allocation5 + $0x48] sm:$0xf]  ;;  %v2024_v34 = vld [vmem:[#allocation5 + $0x54] sm:$0xf0] }
  0x39   :  { %572 = vmatpush.bf16.msrb.mxu2 %v1618_v46  ;;  %538 = vmatmul.bf16.vlgmr.msra.gmra.mxu3 %v2350_v55  ;;  %v1661_v35 = vld [vmem:[#allocation5 + $0x148] sm:$0xf]  ;;  %v1682_v36 = vor.u32 %v2058_v28, %v1679_v29  ;;  %v2056_v37 = vld [vmem:[#allocation5 + $0x154] sm:$0xf0]  ;;  %v2022_v38 = vld [vmem:[#allocation5 + $0x4c] sm:$0xf]  ;;  %v1534_v42 = vor.u32 %v2024_v34, %v1533_v33 }
  0x3a   :  { %586 = vmatpush.bf16.msrb.mxu3 %v1746_v50  ;;  %v1535_v39 = vld [vmem:[#allocation5 + $0x58] sm:$0xf0]  ;;  %v2054_v40 = vld [vmem:[#allocation5 + $0x14c] sm:$0xf]  ;;  %v1662_v43 = vor.u32 %v2056_v37, %v1661_v35  ;;  %v1517_v45 = vld [vmem:[#allocation5 + $0x28] sm:$0xf] }
  0x3b   :  { %545 = vmatpush.bf16.msrb.mxu0 %v1598_v58  ;;  %v1663_v41 = vld [vmem:[#allocation5 + $0x158] sm:$0xf0]  ;;  %v1538_v44 = vor.u32 %v2022_v38, %v1535_v39  ;;  %v2020_v46 = vld [vmem:[#allocation5 + $0x34] sm:$0xf0]  ;;  %v1645_v47 = vld [vmem:[#allocation5 + $0x128] sm:$0xf] }
  0x3c   :  { %559 = vmatpush.bf16.msrb.mxu1 %v1726_v59  ;;  %v1666_v48 = vor.u32 %v2054_v40, %v1663_v41  ;;  %v2052_v49 = vld [vmem:[#allocation5 + $0x134] sm:$0xf0]  ;;  %v2018_v50 = vld [vmem:[#allocation5 + $0x2c] sm:$0xf]  ;;  %v1519_v52 = vld [vmem:[#allocation5 + $0x38] sm:$0xf0]  ;;  %v1518_v56 = vor.u32 %v2020_v46, %v1517_v45 }
  0x3d   :  { %573 = vmatpush.bf16.msrb.mxu2 %v1602_v60  ;;  %v2050_v53 = vld [vmem:[#allocation5 + $0x12c] sm:$0xf]  ;;  %v1647_v54 = vld [vmem:[#allocation5 + $0x138] sm:$0xf0]  ;;  %v1646_v57 = vor.u32 %v2052_v49, %v1645_v47  ;;  %v1522_v58 = vor.u32 %v2018_v50, %v1519_v52  ;;  %v1501_v59 = vld [vmem:[#allocation5 + $0x8] sm:$0xf] }
  0x3e   :  { %587 = vmatpush.bf16.msrb.mxu3 %v1730_v0  ;;  %v2016_v60 = vld [vmem:[#allocation5 + $0x14] sm:$0xf0]  ;;  %v1629_v61 = vld [vmem:[#allocation5 + $0x108] sm:$0xf]  ;;  %v1650_v62 = vor.u32 %v2050_v53, %v1647_v54  ;;  %v2014_v0 = vld [vmem:[#allocation5 + $0xc] sm:$0xf] }
  0x3f   :  { %546 = vmatpush.bf16.msrb.mxu0 %v1582_v6  ;;  %v2048_v63 = vld [vmem:[#allocation5 + $0x114] sm:$0xf0]  ;;  %v1503_v1 = vld [vmem:[#allocation5 + $0x18] sm:$0xf0]  ;;  %v2046_v2 = vld [vmem:[#allocation5 + $0x10c] sm:$0xf]  ;;  %v1502_v4 = vor.u32 %v2016_v60, %v1501_v59 }
  0x40   :  { %560 = vmatpush.bf16.msrb.mxu1 %v1710_v7  ;;  %v1631_v3 = vld [vmem:[#allocation5 + $0x118] sm:$0xf0]  ;;  %v1630_v5 = vor.u32 %v2048_v63, %v1629_v61  ;;  %v1506_v6 = vor.u32 %v2014_v0, %v1503_v1  ;;  %v1813_v10 = vld [vmem:[#allocation8 + $0x70] sm:$0xf]  ;;  %v1805_v16 = vld [vmem:[#allocation8 + $0x60] sm:$0xf] }
  0x41   :  { %574 = vmatpush.bf16.msrb.mxu2 %v1586_v8  ;;  %v1634_v7 = vor.u32 %v2046_v2, %v1631_v3  ;;  %v2360_v8 = vld [vmem:[#allocation7] sm:$0xf]  ;;  %v2092_v11 = vld [vmem:[#allocation8 + $0x74] sm:$0xf0]  ;;  %v2090_v17 = vld [vmem:[#allocation8 + $0x64] sm:$0xf0] }
  0x42   :  { %588 = vmatpush.bf16.msrb.mxu3 %v1714_v12  ;;  %v150_v9 = vperm.slane %v2360_v8, 0  ;;  %v1814_v12 = vor.u32 %v2092_v11, %v1813_v10  ;;  %v1797_v28 = vld [vmem:[#allocation8 + $0x50] sm:$0xf]  ;;  %v2088_v29 = vld [vmem:[#allocation8 + $0x54] sm:$0xf0]  ;;  %s1468_s18 = sshll.u32 %s2771_s5, 4  ;;  %s1469_s18 = int_to_ptr.hbm [resolvable:$true] %s1468_s18 }
  0x43   :  { %547 = vmatpush.bf16.msrb.mxu0 %v1566_v18  ;;  %v1798_v33 = vor.u32 %v2088_v29, %v1797_v28  ;;  %v1869_v35 = vld [vmem:[#allocation8 + $0xe0] sm:$0xf]  ;;  %v2086_v47 = vld [vmem:[#allocation8 + $0x44] sm:$0xf0]  ;;  %v1861_v2 = vld [vmem:[#allocation8 + $0xd0] sm:$0xf] }
  0x44   :  { %561 = vmatpush.bf16.msrb.mxu1 %v1694_v19  ;;  %v1806_v19 = vor.u32 %v2090_v17, %v1805_v16  ;;  %v2104_v3 = vld [vmem:[#allocation8 + $0xd4] sm:$0xf0] }
  0x45   :  { %575 = vmatpush.bf16.msrb.mxu2 %v1570_v20  ;;  %v1877_v20 = vld [vmem:[#allocation8 + $0xf0] sm:$0xf] }
  0x46   :  { %589 = vmatpush.bf16.msrb.mxu3 %v1698_v24 }
  0x47   :  { %548 = vmatpush.bf16.msrb.mxu0 %v1550_v30 }
  0x48   :  { %562 = vmatpush.bf16.msrb.mxu1 %v1678_v31 }
  0x49   :  { %576 = vmatpush.bf16.msrb.mxu2 %v1554_v32 }
  0x4a   :  { %590 = vmatpush.bf16.msrb.mxu3 %v1682_v36  ;;  %v2106_v36 = vld [vmem:[#allocation8 + $0xe4] sm:$0xf0] }
  0x4b   :  { %549 = vmatpush.bf16.msrb.mxu0 %v1534_v42  ;;  %v1870_v40 = vor.u32 %v2106_v36, %v1869_v35  ;;  %v1789_v42 = vld [vmem:[#allocation8 + $0x40] sm:$0xf] }
  0x4c   :  { %563 = vmatpush.bf16.msrb.mxu1 %v1662_v43  ;;  %v1790_v52 = vor.u32 %v2086_v47, %v1789_v42  ;;  %v152_v42 = vperm.slane %v2360_v8, 2 }
  0x4d   :  { %577 = vmatpush.bf16.msrb.mxu2 %v1538_v44 }
  0x4e   :  { %591 = vmatpush.bf16.msrb.mxu3 %v1666_v48 }
  0x4f   :  { %550 = vmatpush.bf16.msrb.mxu0 %v1518_v56 }
  0x50   :  { %564 = vmatpush.bf16.msrb.mxu1 %v1646_v57 }
  0x51   :  { %578 = vmatpush.bf16.msrb.mxu2 %v1522_v58 }
  0x52   :  { %592 = vmatpush.bf16.msrb.mxu3 %v1650_v62 }
  0x53   :  { %551 = vmatpush.bf16.msrb.mxu0 %v1502_v4 }
  0x54   :  { %565 = vmatpush.bf16.msrb.mxu1 %v1630_v5 }
  0x55   :  { %579 = vmatpush.bf16.msrb.mxu2 %v1506_v6 }
  0x56   :  { %593 = vmatpush.bf16.msrb.mxu3 %v1634_v7  ;;  %552 = vmatmul.bf16.vlgmr.msrb.gmra.mxu0 %v2348_v51  ;;  %v1862_v7 = vor.u32 %v2104_v3, %v1861_v2 }
  0x57   :  { %566 = vmatmul.bf16.vlgmr.msrb.gmra.mxu1 %v2350_v55  ;;  %1346 = vmatpush.bf16.msra.mxu0 %v1814_v12 }
  0x58   :  { %580 = vmatmul.bf16.vlgmr.msrb.gmra.mxu2 %v2348_v51  ;;  %v151_v51 = vperm.slane %v2360_v8, 1 }
  0x59   :  { %594 = vmatmul.bf16.vlgmr.msrb.gmra.mxu3 %v2350_v55  ;;  %v2108_v55 = vld [vmem:[#allocation8 + $0xf4] sm:$0xf0] }
  0x5a   :  { %v1878_v22 = vor.u32 %v2108_v55, %v1877_v20 }
  0x5b   :  { %1347 = vmatpush.bf16.msra.mxu0 %v1806_v19 }
  0x5c   :  { %1360 = vmatpush.bf16.msra.mxu1 %v1878_v22 }
  0x5f   :  { %1348 = vmatpush.bf16.msra.mxu0 %v1798_v33 }
  0x60   :  { %1361 = vmatpush.bf16.msra.mxu1 %v1870_v40 }
  0x63   :  { %1349 = vmatpush.bf16.msra.mxu0 %v1790_v52  ;;  %v1853_v52 = vld [vmem:[#allocation8 + $0xc0] sm:$0xf] }
  0x64   :  { %1362 = vmatpush.bf16.msra.mxu1 %v1862_v7 }
  0xb3   :  { %v497_v13 = vpop.f32.mrf.mxu0 }
  0xb4   :  { %v498_v14 = vadd.f32 %v497_v13, %v150_v9  ;;  %v511_v15 = vpop.f32.mrf.mxu1 }
  0xb6   :  { %v2363_v18 = vadd.f32 %v511_v15, %v498_v14 }
  0xb8   :  { %v2367_v21 = vmul.f32 0.70710677, %v2363_v18 }
  0xba   :  { %v616_v23 = vmul.f32 %v2367_v21, %v2367_v21 }
  0xbb   :  { %v525_v24 = vpop.f32.mrf.mxu2  ;;  %v499_v26 = vpop.f32.mrf.mxu0 }
  0xbc   :  { %v526_v25 = vadd.f32 %v525_v24, %v151_v51  ;;  %v539_v27 = vpop.f32.mrf.mxu3  ;;  %v2371_v30 = vmin.f32 %v616_v23, 16.0  ;;  %v500_v31 = vadd.f32 %v499_v26, %v150_v9  ;;  %v513_v32 = vpop.f32.mrf.mxu1  ;;  %v1781_v24 = vld [vmem:[#allocation8 + $0x30] sm:$0xf] }
  0xbe   :  { %v2373_v34 = vadd.f32 %v539_v27, %v526_v25  ;;  %v618_v37 = vmul.f32 2.1237322e-06, %v2371_v30  ;;  %v629_v38 = vmul.f32 3.8918573e-05, %v2371_v30  ;;  %v2377_v39 = vadd.f32 %v513_v32, %v500_v31  ;;  %v2084_v27 = vld [vmem:[#allocation8 + $0x34] sm:$0xf0] }
  0xbf   :  { %v1782_v36 = vor.u32 %v2084_v27, %v1781_v24 }
  0xc0   :  { %v2380_v41 = vmul.f32 0.70710677, %v2373_v34  ;;  %v619_v43 = vadd.f32 0.00028619796, %v618_v37  ;;  %v630_v44 = vadd.f32 0.001143296, %v629_v38 }
  0xc1   :  { %v2385_v46 = vmul.f32 0.70710677, %v2377_v39  ;;  %1350 = vmatpush.bf16.msra.mxu0 %v1782_v36 }
  0xc2   :  { %v656_v45 = vmul.f32 %v2380_v41, %v2380_v41  ;;  %v620_v48 = vmul.f32 %v619_v43, %v2371_v30  ;;  %v631_v49 = vmul.f32 %v630_v44, %v2371_v30 }
  0xc3   :  { %v527_v50 = vpop.f32.mrf.mxu2  ;;  %v776_v54 = vmul.f32 %v2385_v46, %v2385_v46 }
  0xc4   :  { %v2389_v53 = vmin.f32 %v656_v45, 16.0  ;;  %v528_v56 = vadd.f32 %v527_v50, %v151_v51  ;;  %v541_v57 = vpop.f32.mrf.mxu3  ;;  %v621_v58 = vadd.f32 0.0036580483, %v620_v48  ;;  %v632_v59 = vadd.f32 0.014752088, %v631_v49 }
  0xc5   :  { %v2395_v62 = vmin.f32 %v776_v54, 16.0 }
  0xc6   :  { %v658_v60 = vmul.f32 2.1237322e-06, %v2389_v53  ;;  %v669_v61 = vmul.f32 3.8918573e-05, %v2389_v53  ;;  %v622_v63 = vmul.f32 %v621_v58, %v2371_v30  ;;  %v633_v0 = vmul.f32 %v632_v59, %v2371_v30  ;;  %v2102_v58 = vld [vmem:[#allocation8 + $0xc4] sm:$0xf0] }
  0xc7   :  { %v2399_v1 = vadd.f32 %v541_v57, %v528_v56  ;;  %v778_v6 = vmul.f32 2.1237322e-06, %v2395_v62  ;;  %v789_v10 = vmul.f32 3.8918573e-05, %v2395_v62 }
  0xc8   :  { %v659_v4 = vadd.f32 0.00028619796, %v658_v60  ;;  %v670_v5 = vadd.f32 0.001143296, %v669_v61  ;;  %v634_v9 = vadd.f32 0.112945676, %v633_v0 }
  0xc9   :  { %v623_v11 = vadd.f32 0.05243302, %v622_v63  ;;  %v779_v14 = vadd.f32 0.00028619796, %v778_v6  ;;  %v790_v16 = vadd.f32 0.001143296, %v789_v10  ;;  %v1854_v6 = vor.u32 %v2102_v58, %v1853_v52 }
  0xca   :  { %v660_v12 = vmul.f32 %v659_v4, %v2389_v53  ;;  %v671_v13 = vmul.f32 %v670_v5, %v2389_v53  ;;  %v635_v15 = vmul.f32 %v634_v9, %v2371_v30  ;;  %v2407_v17 = vmul.f32 0.70710677, %v2399_v1 }
  0xcb   :  { %v780_v20 = vmul.f32 %v779_v14, %v2395_v62  ;;  %v791_v22 = vmul.f32 %v790_v16, %v2395_v62  ;;  %v624_v25 = vmul.f32 %v623_v11, %v2371_v30  ;;  %1363 = vmatpush.bf16.msra.mxu1 %v1854_v6  ;;  %v153_v16 = vperm.slane %v2360_v8, 3 }
  0xcc   :  { %v661_v19 = vadd.f32 0.0036580483, %v660_v12  ;;  %v672_v51 = vadd.f32 0.014752088, %v671_v13  ;;  %v636_v55 = vadd.f32 0.4994258, %v635_v15  ;;  %v816_v23 = vmul.f32 %v2407_v17, %v2407_v17 }
  0xcd   :  { %v781_v29 = vadd.f32 0.0036580483, %v780_v20  ;;  %v792_v31 = vadd.f32 0.014752088, %v791_v22  ;;  %v625_v43 = vadd.f32 0.18741608, %v624_v25 }
  0xce   :  { %v673_v26 = vmul.f32 %v672_v51, %v2389_v53  ;;  %v637_v28 = vmul.f32 %v636_v55, %v2371_v30  ;;  %v2416_v32 = vmin.f32 %v816_v23, 16.0  ;;  %v662_v33 = vmul.f32 %v661_v19, %v2389_v53  ;;  %v1773_v19 = vld [vmem:[#allocation8 + $0x20] sm:$0xf]  ;;  %v2082_v23 = vld [vmem:[#allocation8 + $0x24] sm:$0xf0] }
  0xcf   :  { %v793_v38 = vmul.f32 %v792_v31, %v2395_v62  ;;  %v782_v47 = vmul.f32 %v781_v29, %v2395_v62  ;;  %v626_v59 = vmul.f32 %v625_v43, %v2371_v30  ;;  %v2443_v13 = vmul.f32 0.5, %v2363_v18 }
  0xd0   :  { %v674_v35 = vadd.f32 0.112945676, %v673_v26  ;;  %v2419_v37 = vadd.f32 1.0, %v637_v28  ;;  %v818_v40 = vmul.f32 2.1237322e-06, %v2416_v32  ;;  %v1774_v36 = vor.u32 %v2082_v23, %v1773_v19 }
  0xd1   :  { %v829_v48 = vmul.f32 3.8918573e-05, %v2416_v32  ;;  %v663_v49 = vadd.f32 0.05243302, %v662_v33  ;;  %v794_v54 = vadd.f32 0.112945676, %v793_v38 }
  0xd2   :  { %v675_v44 = vmul.f32 %v674_v35, %v2389_v53  ;;  %2150 = vrcp.f32 %v2419_v37  ;;  %v819_v56 = vadd.f32 0.00028619796, %v818_v40  ;;  %v783_v61 = vadd.f32 0.05243302, %v782_v47  ;;  %1351 = vmatpush.bf16.msra.mxu0 %v1774_v36 }
  0xd3   :  { %v553_v45 = vpop.f32.mrf.mxu0  ;;  %v795_v63 = vmul.f32 %v794_v54, %v2395_v62  ;;  %v830_v2 = vadd.f32 0.001143296, %v829_v48  ;;  %v664_v3 = vmul.f32 %v663_v49, %v2389_v53  ;;  %v627_v14 = vadd.f32 1.1283791, %v626_v59 }
  0xd4   :  { %v676_v50 = vadd.f32 0.4994258, %v675_v44  ;;  %v554_v57 = vadd.f32 %v553_v45, %v152_v42  ;;  %v820_v0 = vmul.f32 %v819_v56, %v2416_v32  ;;  %v567_v5 = vpop.f32.mrf.mxu1  ;;  %v784_v15 = vmul.f32 %v783_v61, %v2395_v62 }
  0xd5   :  { %v796_v9 = vadd.f32 0.4994258, %v795_v63  ;;  %v831_v11 = vmul.f32 %v830_v2, %v2416_v32  ;;  %v648_v24 = vand.u32 2147483647, %v2419_v37  ;;  %v665_v25 = vadd.f32 0.18741608, %v664_v3 }
  0xd6   :  { %v677_v60 = vmul.f32 %v676_v50, %v2389_v53  ;;  %v821_v10 = vadd.f32 0.0036580483, %v820_v0  ;;  %v2438_v30 = vadd.f32 %v567_v5, %v554_v57  ;;  %v650_v31 = vand.u32 2147483648, %v2419_v37 }
  0xd7   :  { %v797_v20 = vmul.f32 %v796_v9, %v2395_v62  ;;  %v832_v22 = vadd.f32 0.014752088, %v831_v11  ;;  %v785_v33 = vadd.f32 0.18741608, %v784_v15  ;;  %vm644_vm1 = vweird.f32 %v2419_v37 }
  0xd8   :  { %v2435_v4 = vadd.f32 1.0, %v677_v60  ;;  %v2151_v7 = vpop.eup %2150  ;;  %v822_v55 = vmul.f32 %v821_v10, %v2416_v32  ;;  %v2451_v18 = vmul.f32 0.70710677, %v2438_v30  ;;  %v2463_v43 = vmul.f32 0.5, %v2373_v34 }
  0xd9   :  { %v640_v12 = vmul.f32 %v2151_v7, %v2419_v37  ;;  %vm645_vm0 = vweird.f32 %v2151_v7  ;;  %v2453_v27 = vadd.f32 1.0, %v797_v20  ;;  %v833_v29 = vmul.f32 %v832_v22, %v2416_v32 }
  0xda   :  { %2152 = vrcp.f32 %v2435_v4  ;;  %v823_v28 = vadd.f32 0.05243302, %v822_v55  ;;  %v696_v35 = vmul.f32 %v2451_v18, %v2451_v18  ;;  %vm2467_vm2 = vmor %vm644_vm1, %vm645_vm0  ;;  %v666_v47 = vmul.f32 %v665_v25, %v2389_v53 }
  0xdb   :  { %v641_v51 = vsub.f32 1.0, %v640_v12  ;;  %2154 = vrcp.f32 %v2453_v27  ;;  %v581_v44 = vpop.f32.mrf.mxu2  ;;  %v2475_v49 = vmul.f32 0.5, %v2377_v39  ;;  %v628_v34 = vmul.f32 %v627_v14, %v2367_v21  ;;  %v555_v60 = vpop.f32.mrf.mxu0 }
  0xdc   :  { %v824_v37 = vmul.f32 %v823_v28, %v2416_v32  ;;  %v834_v52 = vadd.f32 0.112945676, %v833_v29  ;;  %v2481_v54 = vmin.f32 %v696_v35, 16.0  ;;  %vm649_vm3 = vcmp.eq.f32.partialorder %v648_v24, 8.507059e+37  ;;  %v569_v29 = vpop.f32.mrf.mxu1 }
  0xdd   :  { %v642_v26 = vmul.f32 %v2151_v7, %v641_v51  ;;  %v651_v56 = vor.u32 1.1754944e-38, %v650_v31  ;;  %v786_v53 = vmul.f32 %v785_v33, %v2395_v62  ;;  %v582_v57 = vadd.f32 %v581_v44, %v153_v16 }
  0xde   :  { %v835_v58 = vmul.f32 %v834_v52, %v2416_v32  ;;  %v698_v59 = vmul.f32 2.1237322e-06, %v2481_v54  ;;  %v709_v21 = vmul.f32 3.8918573e-05, %v2481_v54  ;;  %v2489_v63 = vadd.f32 1.1283791, %v666_v47 }
  0xdf   :  { %v643_v40 = vadd.f32 %v2151_v7, %v642_v26  ;;  %v688_v0 = vand.u32 2147483647, %v2435_v4  ;;  %v825_v2 = vadd.f32 0.18741608, %v824_v37  ;;  %vm684_vm4 = vweird.f32 %v2435_v4 }
  0xe0   :  { %v2459_v38 = vpop.eup %2152  ;;  %v690_v62 = vand.u32 2147483648, %v2435_v4  ;;  %v836_v5 = vadd.f32 0.4994258, %v835_v58  ;;  %v699_v6 = vadd.f32 0.00028619796, %v698_v59  ;;  %v556_v12 = vadd.f32 %v555_v60, %v152_v42 }
  0xe1   :  { %v680_v48 = vmul.f32 %v2459_v38, %v2435_v4  ;;  %v647_v50 = vsel %vm2467_vm2, %v2151_v7, %v643_v40  ;;  %v2155_v3 = vpop.eup %2154  ;;  %v595_v7 = vpop.f32.mrf.mxu3  ;;  %v787_v9 = vadd.f32 1.1283791, %v786_v53  ;;  %v710_v51 = vadd.f32 0.001143296, %v709_v21 }
  0xe2   :  { %v652_v61 = vsel %vm649_vm3, %v651_v56, %v647_v50  ;;  %v800_v10 = vmul.f32 %v2155_v3, %v2453_v27  ;;  %v2495_v11 = vadd.f32 %v595_v7, %v582_v57  ;;  %v837_v19 = vmul.f32 %v836_v5, %v2416_v32 }
  0xe3   :  { %v681_v39 = vsub.f32 1.0, %v680_v48  ;;  %v653_v14 = vmul.f32 %v652_v61, %v628_v34  ;;  %vm804_vm5 = vweird.f32 %v2453_v27  ;;  %v826_v55 = vmul.f32 %v825_v2, %v2416_v32  ;;  %v583_v35 = vpop.f32.mrf.mxu2 }
  0xe4   :  { %v801_v20 = vsub.f32 1.0, %v800_v10  ;;  %v700_v22 = vmul.f32 %v699_v6, %v2481_v54  ;;  %vm685_vm6 = vweird.f32 %v2459_v38  ;;  %v808_v23 = vand.u32 2147483647, %v2453_v27 }
  0xe5   :  { %v682_v15 = vmul.f32 %v2459_v38, %v681_v39  ;;  %v810_v24 = vand.u32 2147483648, %v2453_v27  ;;  %v2507_v42 = vadd.f32 1.0, %v837_v19  ;;  %vm805_vm7 = vweird.f32 %v2155_v3  ;;  %vm2539_vm10 = vmor %vm684_vm4, %vm685_vm6 }
  0xe6   :  { %v802_v25 = vmul.f32 %v2155_v3, %v801_v20  ;;  %v711_v26 = vmul.f32 %v710_v51, %v2481_v54  ;;  %v2511_v28 = vmul.f32 0.70710677, %v2495_v11  ;;  %v1747_v31 = vclamps-f32 %v653_v14, 1.0  ;;  %vm2525_vm8 = vmor %vm804_vm5, %vm805_vm7 }
  0xe7   :  { %v2514_v32 = vadd.f32 %v2459_v38, %v682_v15  ;;  %2156 = vrcp.f32 %v2507_v42  ;;  %v2517_v33 = vadd.f32 %v569_v29, %v556_v12  ;;  %v827_v40 = vadd.f32 1.1283791, %v826_v55 }
  0xe8   :  { %v803_v36 = vadd.f32 %v2155_v3, %v802_v25  ;;  %v701_v44 = vadd.f32 0.0036580483, %v700_v22  ;;  %v712_v45 = vadd.f32 0.014752088, %v711_v26  ;;  %v2519_v47 = vor.u32 1.1754944e-38, %v690_v62 }
  0xe9   :  { %v788_v48 = vmul.f32 %v787_v9, %v2385_v46  ;;  %vm2529_vm9 = vcmp.eq.f32.partialorder %v808_v23, 8.507059e+37  ;;  %v736_v50 = vmul.f32 %v2511_v28, %v2511_v28  ;;  %v811_v52 = vor.u32 1.1754944e-38, %v810_v24  ;;  %v597_v62 = vpop.f32.mrf.mxu3  ;;  %v1845_v24 = vld [vmem:[#allocation8 + $0xb0] sm:$0xf] }
  0xea   :  { %v807_v27 = vsel %vm2525_vm8, %v2155_v3, %v803_v36  ;;  %v713_v56 = vmul.f32 %v712_v45, %v2481_v54  ;;  %v584_v53 = vadd.f32 %v583_v35, %v153_v16  ;;  %v2548_v57 = vadd.f32 1.0, %v1747_v31  ;;  %v2100_v31 = vld [vmem:[#allocation8 + $0xb4] sm:$0xf0] }
  0xeb   :  { %v687_v4 = vsel %vm2539_vm10, %v2459_v38, %v2514_v32  ;;  %v2554_v39 = vmin.f32 %v736_v50, 16.0  ;;  %v2557_v58 = vmul.f32 0.70710677, %v2517_v33  ;;  %v828_v59 = vmul.f32 %v827_v40, %v2407_v17 }
  0xec   :  { %v848_v21 = vand.u32 2147483647, %v2507_v42  ;;  %v702_v60 = vmul.f32 %v701_v44, %v2481_v54  ;;  %v714_v8 = vadd.f32 0.112945676, %v713_v56  ;;  %v812_v61 = vsel %vm2529_vm9, %v811_v52, %v807_v27 }
  0xed   :  { %v2157_v16 = vpop.eup %2156  ;;  %v738_v2 = vmul.f32 2.1237322e-06, %v2554_v39  ;;  %v749_v38 = vmul.f32 3.8918573e-05, %v2554_v39  ;;  %v856_v3 = vmul.f32 %v2557_v58, %v2557_v58  ;;  %vm2568_vm11 = vcmp.eq.f32.partialorder %v688_v0, 8.507059e+37 }
  0xee   :  { %v840_v17 = vmul.f32 %v2157_v16, %v2507_v42  ;;  %vm844_vm12 = vweird.f32 %v2507_v42  ;;  %v850_v6 = vand.u32 2147483648, %v2507_v42  ;;  %v2575_v7 = vadd.f32 %v597_v62, %v584_v53  ;;  %v2080_v62 = vld [vmem:[#allocation8 + $0x14] sm:$0xf0] }
  0xef   :  { %v715_v9 = vmul.f32 %v714_v8, %v2481_v54  ;;  %v739_v10 = vadd.f32 0.00028619796, %v738_v2  ;;  %v750_v12 = vadd.f32 0.001143296, %v749_v38  ;;  %v2578_v14 = vmin.f32 %v856_v3, 16.0 }
  0xf0   :  { %v813_v15 = vmul.f32 %v812_v61, %v788_v48  ;;  %v841_v19 = vsub.f32 1.0, %v840_v17  ;;  %vm2580_vm13 = vcmp.eq.f32.partialorder %v848_v21, 8.507059e+37  ;;  %v703_v51 = vadd.f32 0.05243302, %v702_v60  ;;  %v1765_v61 = vld [vmem:[#allocation8 + $0x10] sm:$0xf] }
  0xf1   :  { %v716_v20 = vadd.f32 0.4994258, %v715_v9  ;;  %v740_v55 = vmul.f32 %v739_v10, %v2554_v39  ;;  %v751_v22 = vmul.f32 %v750_v12, %v2554_v39  ;;  %v858_v23 = vmul.f32 2.1237322e-06, %v2578_v14 }
  0xf2   :  { %v842_v25 = vmul.f32 %v2157_v16, %v841_v19  ;;  %vm845_vm14 = vweird.f32 %v2157_v16  ;;  %v869_v26 = vmul.f32 3.8918573e-05, %v2578_v14  ;;  %v2589_v29 = vmul.f32 0.70710677, %v2575_v7 }
  0xf3   :  { %v717_v32 = vmul.f32 %v716_v20, %v2481_v54  ;;  %v741_v35 = vadd.f32 0.0036580483, %v740_v55  ;;  %v752_v36 = vadd.f32 0.014752088, %v751_v22  ;;  %v859_v40 = vadd.f32 0.00028619796, %v858_v23  ;;  %vm846_vm15 = vmor %vm844_vm12, %vm845_vm14 }
  0xf4   :  { %v1751_v44 = vclamps-f32 %v813_v15, 1.0  ;;  %v843_v45 = vadd.f32 %v2157_v16, %v842_v25  ;;  %v851_v48 = vor.u32 1.1754944e-38, %v850_v6  ;;  %v870_v37 = vadd.f32 0.001143296, %v869_v26 }
  0xf5   :  { %v704_v34 = vmul.f32 %v703_v51, %v2481_v54  ;;  %v2595_v50 = vadd.f32 1.0, %v717_v32  ;;  %v753_v46 = vmul.f32 %v752_v36, %v2554_v39  ;;  %v860_v27 = vmul.f32 %v859_v40, %v2578_v14 }
  0xf6   :  { %v847_v52 = vsel %vm846_vm15, %v2157_v16, %v843_v45  ;;  %v871_v56 = vmul.f32 %v870_v37, %v2578_v14  ;;  %v896_v53 = vmul.f32 %v2589_v29, %v2589_v29  ;;  %v1846_v21 = vor.u32 %v2100_v31, %v1845_v24 }
  0xf7   :  { %v692_v42 = vsel %vm2568_vm11, %v2519_v47, %v687_v4  ;;  %v852_v60 = vsel %vm2580_vm13, %v851_v48, %v847_v52  ;;  %2158 = vrcp.f32 %v2595_v50  ;;  %v742_v8 = vmul.f32 %v741_v35, %v2554_v39 }
  0xf8   :  { %v668_v16 = vmul.f32 %v2489_v63, %v2380_v41  ;;  %v940_v2 = vadd.f32 1.0, %v1751_v44  ;;  %v2612_v38 = vmul.f32 0.5, %v2399_v1  ;;  %v754_v3 = vadd.f32 0.112945676, %v753_v46  ;;  %1364 = vmatpush.bf16.msra.mxu1 %v1846_v21  ;;  %v1837_v41 = vld [vmem:[#allocation8 + $0xa0] sm:$0xf] }
  0xf9   :  { %v853_v5 = vmul.f32 %v852_v60, %v828_v59  ;;  %v861_v47 = vadd.f32 0.0036580483, %v860_v27  ;;  %v872_v4 = vadd.f32 0.014752088, %v871_v56  ;;  %v2614_v17 = vmin.f32 %v896_v53, 16.0 }
  0xfa   :  { %v944_v6 = vmul.f32 %v2548_v57, %v2443_v13  ;;  %v693_v9 = vmul.f32 %v692_v42, %v668_v16  ;;  %v705_v10 = vadd.f32 0.18741608, %v704_v34  ;;  %v755_v12 = vmul.f32 %v754_v3, %v2554_v39  ;;  %v2098_v63 = vld [vmem:[#allocation8 + $0xa4] sm:$0xf0]  ;;  %v1757_v13 = vld [vmem:[#allocation8] sm:$0xf] }
  0xfb   :  { %v743_v15 = vadd.f32 0.05243302, %v742_v8  ;;  %v862_v1 = vmul.f32 %v861_v47, %v2578_v14  ;;  %v873_v19 = vmul.f32 %v872_v4, %v2578_v14  ;;  %v898_v59 = vmul.f32 2.1237322e-06, %v2614_v17  ;;  %v1941_v46 = vld [vmem:[#allocation8 + $0x170] sm:$0xf] }
  0xfc   :  { %v948_v0 = vmul.f32 %v940_v2, %v2475_v49  ;;  %v756_v51 = vadd.f32 0.4994258, %v755_v12  ;;  %v909_v20 = vmul.f32 3.8918573e-05, %v2614_v17  ;;  %v1766_v55 = vor.u32 %v2080_v62, %v1765_v61  ;;  %v2078_v49 = vld [vmem:[#allocation8 + $0x4] sm:$0xf0] }
  0xfd   :  { %v2624_v57 = vpop.eup %2158  ;;  %v1752_v22 = vclamps-f32 %v853_v5, 1.0  ;;  %v874_v23 = vadd.f32 0.112945676, %v873_v19  ;;  %v899_v24 = vadd.f32 0.00028619796, %v898_v59  ;;  %v1838_v25 = vor.u32 %v2098_v63, %v1837_v41 }
  0xfe   :  { %v1748_v26 = vclamps-f32 %v693_v9, 1.0  ;;  %v706_v31 = vmul.f32 %v705_v10, %v2481_v54  ;;  %v720_v32 = vmul.f32 %v2624_v57, %v2595_v50  ;;  %v863_v35 = vadd.f32 0.05243302, %v862_v1  ;;  %1352 = vmatpush.bf16.msra.mxu0 %v1766_v55  ;;  %v2124_v21 = vld [vmem:[#allocation8 + $0x174] sm:$0xf0] }
  0xff   :  { %v744_v36 = vmul.f32 %v743_v15, %v2554_v39  ;;  %v757_v40 = vmul.f32 %v756_v51, %v2554_v39  ;;  %v875_v44 = vmul.f32 %v874_v23, %v2578_v14  ;;  %v900_v45 = vmul.f32 %v899_v24, %v2614_v17  ;;  %1365 = vmatpush.bf16.msra.mxu1 %v1838_v25  ;;  %v2091_v16 = vld [vmem:[#allocation8 + $0x74] sm:$0xf]  ;;  %v1815_v2 = vld [vmem:[#allocation8 + $0x78] sm:$0xf0]  ;;  %v2096_v9 = vld [vmem:[#allocation8 + $0x94] sm:$0xf0] }
 0x100   :  { %v2633_v48 = vpack.c.bf16 %v948_v0, %v944_v6  ;;  %v2636_v37 = vmul.f32 0.5, %v2438_v30  ;;  %v721_v54 = vsub.f32 1.0, %v720_v32  ;;  %v910_v34 = vadd.f32 0.001143296, %v909_v20  ;;  %v1829_v30 = vld [vmem:[#allocation8 + $0x90] sm:$0xf] }
 0x101   :  { %v941_v27 = vadd.f32 1.0, %v1752_v22  ;;  %v2638_v52 = vadd.f32 1.0, %v757_v40  ;;  %v876_v56 = vadd.f32 0.4994258, %v875_v44  ;;  %v1758_v53 = vor.u32 %v2078_v49, %v1757_v13  ;;  %v1933_v63 = vld [vmem:[#allocation8 + $0x160] sm:$0xf] }
 0x102   :  { %v722_v42 = vmul.f32 %v2624_v57, %v721_v54  ;;  %v864_v60 = vmul.f32 %v863_v35, %v2578_v14  ;;  %v901_v8 = vadd.f32 0.0036580483, %v900_v45  ;;  %v911_v61 = vmul.f32 %v910_v34, %v2614_v17  ;;  %v2122_v0 = vld [vmem:[#allocation8 + $0x164] sm:$0xf0]  ;;  %v2089_v22 = vld [vmem:[#allocation8 + $0x64] sm:$0xf] }
 0x103   :  { %v937_v3 = vadd.f32 1.0, %v1748_v26  ;;  %v707_v62 = vadd.f32 1.1283791, %v706_v31  ;;  %v745_v5 = vadd.f32 0.18741608, %v744_v36  ;;  %2160 = vrcp.f32 %v2638_v52  ;;  %1353 = vmatpush.bf16.msra.mxu0 %v1758_v53 }
 0x104   :  { %vm724_vm0 = vweird.f32 %v2595_v50  ;;  %v728_v47 = vand.u32 2147483647, %v2595_v50  ;;  %v730_v4 = vand.u32 2147483648, %v2595_v50  ;;  %v877_v6 = vmul.f32 %v876_v56, %v2578_v14  ;;  %v1807_v23 = vld [vmem:[#allocation8 + $0x68] sm:$0xf0] }
 0x105   :  { %v723_v10 = vadd.f32 %v2624_v57, %v722_v42  ;;  %vm725_vm1 = vweird.f32 %v2624_v57  ;;  %v912_v12 = vadd.f32 0.014752088, %v911_v61  ;;  %v1942_v41 = vor.u32 %v2124_v21, %v1941_v46  ;;  %v1821_v24 = vld [vmem:[#allocation8 + $0x80] sm:$0xf]  ;;  %v2094_v25 = vld [vmem:[#allocation8 + $0x84] sm:$0xf0] }
 0x106   :  { %v949_v15 = vmul.f32 %v941_v27, %v2612_v38  ;;  %v865_v1 = vadd.f32 0.18741608, %v864_v60  ;;  %v2651_v19 = vadd.f32 1.0, %v877_v6  ;;  %v902_v59 = vmul.f32 %v901_v8, %v2614_v17  ;;  %1354 = vmatmul.bf16.vlgmr.msra.gmra.mxu0 %v2633_v48  ;;  %vm2663_vm2 = vmor %vm724_vm0, %vm725_vm1  ;;  %v2005_v32 = vld [vmem:[#allocation8 + $0x1f0] sm:$0xf] }
 0x107   :  { %v746_v51 = vmul.f32 %v745_v5, %v2554_v39  ;;  %v913_v20 = vmul.f32 %v912_v12, %v2614_v17  ;;  %1374 = vmatpush.bf16.msra.mxu2 %v1942_v41  ;;  %v1818_v55 = vor.u32 %v2091_v16, %v1815_v2  ;;  %v1830_v13 = vor.u32 %v2096_v9, %v1829_v30  ;;  %v2140_v35 = vld [vmem:[#allocation8 + $0x1f4] sm:$0xf0]  ;;  %v2107_v49 = vld [vmem:[#allocation8 + $0xf4] sm:$0xf]  ;;  %v1879_v44 = vld [vmem:[#allocation8 + $0xf8] sm:$0xf0] }
 0x108   :  { %v945_v38 = vmul.f32 %v937_v3, %v2463_v43  ;;  %v708_v26 = vmul.f32 %v707_v62, %v2451_v18  ;;  %vm2667_vm3 = vcmp.eq.f32.partialorder %v728_v47, 8.507059e+37  ;;  %2162 = vrcp.f32 %v2651_v19  ;;  %v1925_v27 = vld [vmem:[#allocation8 + $0x150] sm:$0xf]  ;;  %v2120_v56 = vld [vmem:[#allocation8 + $0x154] sm:$0xf0] }
 0x109   :  { %v2672_v43 = vpop.eup %2160  ;;  %v727_v18 = vsel %vm2663_vm2, %v2624_v57, %v723_v10  ;;  %v731_v50 = vor.u32 1.1754944e-38, %v730_v4  ;;  %v770_v36 = vand.u32 2147483648, %v2638_v52  ;;  %v914_v40 = vadd.f32 0.112945676, %v913_v20  ;;  %1402 = vmatpush.bf16.msrb.mxu0 %v1818_v55  ;;  %1366 = vmatpush.bf16.msra.mxu1 %v1830_v13  ;;  %v2087_v60 = vld [vmem:[#allocation8 + $0x54] sm:$0xf] }
 0x10a   :  { %v760_v45 = vmul.f32 %v2672_v43, %v2638_v52  ;;  %v866_v54 = vmul.f32 %v865_v1, %v2578_v14  ;;  %v903_v34 = vadd.f32 0.05243302, %v902_v59  ;;  %v1934_v46 = vor.u32 %v2122_v0, %v1933_v63  ;;  %v1799_v8 = vld [vmem:[#allocation8 + $0x58] sm:$0xf0]  ;;  %v1997_v61 = vld [vmem:[#allocation8 + $0x1e0] sm:$0xf] }
 0x10b   :  { %v2681_v53 = vpack.c.bf16 %v949_v15, %v945_v38  ;;  %v2683_v21 = vadd.f32 1.1283791, %v746_v51  ;;  %v768_v57 = vand.u32 2147483647, %v2638_v52  ;;  %v915_v42 = vmul.f32 %v914_v40, %v2614_v17  ;;  %v2138_v16 = vld [vmem:[#allocation8 + $0x1e4] sm:$0xf0] }
 0x10c   :  { %v2105_v2 = vld [vmem:[#allocation8 + $0xe4] sm:$0xf]  ;;  %v732_v14 = vsel %vm2667_vm3, %v731_v50, %v727_v18  ;;  %v761_v30 = vsub.f32 1.0, %v760_v45  ;;  %1375 = vmatpush.bf16.msra.mxu2 %v1934_v46  ;;  %v1810_v3 = vor.u32 %v2089_v22, %v1807_v23  ;;  %v1822_v62 = vor.u32 %v2094_v25, %v1821_v24  ;;  %v1871_v5 = vld [vmem:[#allocation8 + $0xe8] sm:$0xf0] }
 0x10d   :  { %v1917_v47 = vld [vmem:[#allocation8 + $0x140] sm:$0xf]  ;;  %v2689_v4 = vor.u32 1.1754944e-38, %v770_v36  ;;  %v916_v6 = vadd.f32 0.4994258, %v915_v42  ;;  %v2006_v9 = vor.u32 %v2140_v35, %v2005_v32  ;;  %v1882_v10 = vor.u32 %v2107_v49, %v1879_v44 }
 0x10e   :  { %v2118_v12 = vld [vmem:[#allocation8 + $0x144] sm:$0xf0]  ;;  %v2691_v41 = vpop.eup %2162  ;;  %v762_v63 = vmul.f32 %v2672_v43, %v761_v30  ;;  %v867_v15 = vadd.f32 1.1283791, %v866_v54  ;;  %v904_v1 = vmul.f32 %v903_v34, %v2614_v17  ;;  %1403 = vmatpush.bf16.msrb.mxu0 %v1810_v3  ;;  %1367 = vmatpush.bf16.msra.mxu1 %v1822_v62  ;;  %v1926_v59 = vor.u32 %v2120_v56, %v1925_v27  ;;  %v2085_v0 = vld [vmem:[#allocation8 + $0x44] sm:$0xf] }
 0x10f   :  { %v1791_v51 = vld [vmem:[#allocation8 + $0x48] sm:$0xf0]  ;;  %v2695_v20 = vmul.f32 %v732_v14, %v708_v26  ;;  %v880_v55 = vmul.f32 %v2691_v41, %v2651_v19  ;;  %v888_v13 = vand.u32 2147483647, %v2651_v19  ;;  %v917_v22 = vmul.f32 %v916_v6, %v2614_v17  ;;  %1388 = vmatpush.bf16.msra.mxu3 %v2006_v9  ;;  %v1989_v23 = vld [vmem:[#allocation8 + $0x1d0] sm:$0xf] }
 0x110   :  { %v2136_v24 = vld [vmem:[#allocation8 + $0x1d4] sm:$0xf0]  ;;  %v890_v25 = vand.u32 2147483648, %v2651_v19  ;;  %1376 = vmatpush.bf16.msra.mxu2 %v1926_v59  ;;  %v1802_v38 = vor.u32 %v2087_v60, %v1799_v8  ;;  %v1998_v31 = vor.u32 %v2138_v16, %v1997_v61  ;;  %v1874_v39 = vor.u32 %v2105_v2, %v1871_v5  ;;  %v2103_v32 = vld [vmem:[#allocation8 + $0xd4] sm:$0xf] }
 0x111   :  { %v1863_v26 = vld [vmem:[#allocation8 + $0xd8] sm:$0xf0]  ;;  %vm765_vm4 = vweird.f32 %v2672_v43  ;;  %v881_v35 = vsub.f32 1.0, %v880_v55  ;;  %v2703_v49 = vadd.f32 1.0, %v917_v22  ;;  %v1918_v18 = vor.u32 %v2118_v12, %v1917_v47  ;;  %v1909_v50 = vld [vmem:[#allocation8 + $0x130] sm:$0xf]  ;;  %1368 = vmatmul.bf16.vlgmr.msra.gmra.mxu1 %v2681_v53 }
 0x112   :  { %1416 = vmatpush.bf16.msrb.mxu1 %v1882_v10  ;;  %v2116_v36 = vld [vmem:[#allocation8 + $0x134] sm:$0xf0]  ;;  %v763_v40 = vadd.f32 %v2672_v43, %v762_v63  ;;  %vm885_vm5 = vweird.f32 %v2691_v41  ;;  %v905_v44 = vadd.f32 0.18741608, %v904_v1  ;;  %1404 = vmatpush.bf16.msrb.mxu0 %v1802_v38  ;;  %v1794_v45 = vor.u32 %v2085_v0, %v1791_v51  ;;  %v2083_v27 = vld [vmem:[#allocation8 + $0x34] sm:$0xf] }
 0x113   :  { %v882_v54 = vmul.f32 %v2691_v41, %v881_v35  ;;  %2164 = vrcp.f32 %v2703_v49  ;;  %1389 = vmatpush.bf16.msra.mxu3 %v1998_v31  ;;  %v1990_v34 = vor.u32 %v2136_v24, %v1989_v23  ;;  %v1866_v46 = vor.u32 %v2103_v32, %v1863_v26  ;;  %v1783_v56 = vld [vmem:[#allocation8 + $0x38] sm:$0xf0]  ;;  %v1981_v42 = vld [vmem:[#allocation8 + $0x1c0] sm:$0xf]  ;;  %v2134_v8 = vld [vmem:[#allocation8 + $0x1c4] sm:$0xf0] }
 0x114   :  { %vm764_vm6 = vweird.f32 %v2638_v52  ;;  %1377 = vmatpush.bf16.msra.mxu2 %v1918_v18  ;;  %v1910_v60 = vor.u32 %v2116_v36, %v1909_v50  ;;  %v2101_v61 = vld [vmem:[#allocation8 + $0xc4] sm:$0xf]  ;;  %v1855_v16 = vld [vmem:[#allocation8 + $0xc8] sm:$0xf0]  ;;  %v1749_v2 = vclamps-f32 %v2695_v20, 1.0  ;;  %v868_v30 = vmul.f32 %v867_v15, %v2557_v58 }
 0x115   :  { %vm2714_vm7 = vmor %vm764_vm6, %vm765_vm4  ;;  %v883_v3 = vadd.f32 %v2691_v41, %v882_v54  ;;  %vm884_vm8 = vweird.f32 %v2651_v19  ;;  %v1901_v62 = vld [vmem:[#allocation8 + $0x120] sm:$0xf]  ;;  %v2114_v5 = vld [vmem:[#allocation8 + $0x124] sm:$0xf0]  ;;  %v891_v6 = vor.u32 1.1754944e-38, %v890_v25  ;;  %v906_v9 = vmul.f32 %v905_v44, %v2614_v17 }
 0x116   :  { %1417 = vmatpush.bf16.msrb.mxu1 %v1874_v39  ;;  %v767_v47 = vsel %vm2714_vm7, %v2672_v43, %v763_v40  ;;  %vm886_vm9 = vmor %vm884_vm8, %vm885_vm5  ;;  %1405 = vmatpush.bf16.msrb.mxu0 %v1794_v45  ;;  %v1786_v10 = vor.u32 %v2083_v27, %v1783_v56  ;;  %v2081_v12 = vld [vmem:[#allocation8 + $0x24] sm:$0xf]  ;;  %vm889_vm10 = vcmp.eq.f32.partialorder %v888_v13, 8.507059e+37  ;;  %v1982_v19 = vor.u32 %v2134_v8, %v1981_v42  ;;  %v1775_v15 = vld [vmem:[#allocation8 + $0x28] sm:$0xf0] }
 0x117   :  { %v887_v58 = vsel %vm886_vm9, %v2691_v41, %v883_v3  ;;  %1390 = vmatpush.bf16.msra.mxu3 %v1990_v34  ;;  %v1858_v63 = vor.u32 %v2101_v61, %v1855_v16  ;;  %v1973_v1 = vld [vmem:[#allocation8 + $0x1b0] sm:$0xf]  ;;  %v1902_v43 = vor.u32 %v2114_v5, %v1901_v62  ;;  %v2132_v0 = vld [vmem:[#allocation8 + $0x1b4] sm:$0xf0]  ;;  %v2099_v51 = vld [vmem:[#allocation8 + $0xb4] sm:$0xf]  ;;  %v748_v23 = vmul.f32 %v2683_v21, %v2511_v28 }
 0x118   :  { %v892_v59 = vsel %vm889_vm10, %v891_v6, %v887_v58  ;;  %1378 = vmatpush.bf16.msra.mxu2 %v1910_v60  ;;  %v1847_v20 = vld [vmem:[#allocation8 + $0xb8] sm:$0xf0]  ;;  %vm769_vm11 = vcmp.eq.f32.partialorder %v768_v57, 8.507059e+37  ;;  %v606_v17 = vmul.f32 0.5, %v2517_v33  ;;  %v1893_v13 = vld [vmem:[#allocation8 + $0x110] sm:$0xf]  ;;  %v1778_v38 = vor.u32 %v2081_v12, %v1775_v15 }
 0x119   :  { %v2728_v55 = vpop.eup %2164  ;;  %v893_v41 = vmul.f32 %v892_v59, %v868_v30  ;;  %v2112_v22 = vld [vmem:[#allocation8 + $0x114] sm:$0xf0]  ;;  %v772_v24 = vsel %vm769_vm11, %v2689_v4, %v767_v47  ;;  %v2079_v31 = vld [vmem:[#allocation8 + $0x14] sm:$0xf]  ;;  %v1767_v39 = vld [vmem:[#allocation8 + $0x18] sm:$0xf0]  ;;  %v1974_v33 = vor.u32 %v2132_v0, %v1973_v1  ;;  %v1850_v26 = vor.u32 %v2099_v51, %v1847_v20 }
 0x11a   :  { %1418 = vmatpush.bf16.msrb.mxu1 %v1866_v46  ;;  %v920_v25 = vmul.f32 %v2728_v55, %v2703_v49  ;;  %1406 = vmatpush.bf16.msrb.mxu0 %v1786_v10  ;;  %v1965_v32 = vld [vmem:[#allocation8 + $0x1a0] sm:$0xf]  ;;  %v907_v57 = vadd.f32 1.1283791, %v906_v9  ;;  %v2130_v35 = vld [vmem:[#allocation8 + $0x1a4] sm:$0xf0]  ;;  %v1894_v28 = vor.u32 %v2112_v22, %v1893_v13  ;;  %v773_v36 = vmul.f32 %v772_v24, %v748_v23 }
 0x11b   :  { %v1753_v52 = vclamps-f32 %v893_v41, 1.0  ;;  %1391 = vmatpush.bf16.msra.mxu3 %v1982_v19  ;;  %v938_v18 = vadd.f32 1.0, %v1749_v2  ;;  %v2097_v21 = vld [vmem:[#allocation8 + $0xa4] sm:$0xf]  ;;  %v1839_v4 = vld [vmem:[#allocation8 + $0xa8] sm:$0xf0]  ;;  %vm925_vm12 = vweird.f32 %v2728_v55  ;;  %v1770_v27 = vor.u32 %v2079_v31, %v1767_v39 }
 0x11c   :  { %v921_v50 = vsub.f32 1.0, %v920_v25  ;;  %1379 = vmatpush.bf16.msra.mxu2 %v1902_v43  ;;  %v930_v44 = vand.u32 2147483648, %v2703_v49  ;;  %v1885_v45 = vld [vmem:[#allocation8 + $0x100] sm:$0xf]  ;;  %v2110_v54 = vld [vmem:[#allocation8 + $0x104] sm:$0xf0]  ;;  %v1966_v60 = vor.u32 %v2130_v35, %v1965_v32  ;;  %v1842_v8 = vor.u32 %v2097_v21, %v1839_v4 }
 0x11d   :  { %v942_v40 = vadd.f32 1.0, %v1753_v52  ;;  %v928_v46 = vand.u32 2147483647, %v2703_v49  ;;  %v2123_v56 = vld [vmem:[#allocation8 + $0x174] sm:$0xf]  ;;  %vm924_vm13 = vweird.f32 %v2703_v49  ;;  %v1886_v3 = vor.u32 %v2110_v54, %v1885_v45 }
 0x11e   :  { %1419 = vmatpush.bf16.msrb.mxu1 %v1858_v63  ;;  %v922_v34 = vmul.f32 %v2728_v55, %v921_v50  ;;  %1407 = vmatpush.bf16.msrb.mxu0 %v1778_v38  ;;  %v1943_v42 = vld [vmem:[#allocation8 + $0x178] sm:$0xf0]  ;;  %v2077_v61 = vld [vmem:[#allocation8 + $0x4] sm:$0xf]  ;;  %v1759_v16 = vld [vmem:[#allocation8 + $0x8] sm:$0xf0]  ;;  %v946_v6 = vmul.f32 %v938_v18, %v2636_v37  ;;  %v908_v9 = vmul.f32 %v907_v57, %v2589_v29 }
 0x11f   :  { %1392 = vmatpush.bf16.msra.mxu3 %v1974_v33  ;;  %v1957_v2 = vld [vmem:[#allocation8 + $0x190] sm:$0xf]  ;;  %v950_v14 = vmul.f32 %v942_v40, %v606_v17  ;;  %v2128_v62 = vld [vmem:[#allocation8 + $0x194] sm:$0xf0]  ;;  %v2095_v5 = vld [vmem:[#allocation8 + $0x94] sm:$0xf]  ;;  %v1946_v12 = vor.u32 %v2123_v56, %v1943_v42  ;;  %v1762_v49 = vor.u32 %v2077_v61, %v1759_v16 }
 0x120   :  { %v923_v30 = vadd.f32 %v2728_v55, %v922_v34  ;;  %1380 = vmatpush.bf16.msra.mxu2 %v1894_v28  ;;  %v1831_v47 = vld [vmem:[#allocation8 + $0x98] sm:$0xf0]  ;;  %vm926_vm14 = vmor %vm924_vm13, %vm925_vm12  ;;  %v931_v10 = vor.u32 1.1754944e-38, %v930_v44  ;;  %v1750_v58 = vclamps-f32 %v773_v36, 1.0  ;;  %vm929_vm15 = vcmp.eq.f32.partialorder %v928_v46, 8.507059e+37 }
 0x121   :  { %v2121_v63 = vld [vmem:[#allocation8 + $0x164] sm:$0xf]  ;;  %v1935_v15 = vld [vmem:[#allocation8 + $0x168] sm:$0xf0]  ;;  %v1958_v59 = vor.u32 %v2128_v62, %v1957_v2  ;;  %v1834_v37 = vor.u32 %v2095_v5, %v1831_v47  ;;  %v1949_v43 = vld [vmem:[#allocation8 + $0x180] sm:$0xf]  ;;  %v2749_v29 = vpack.c.bf16 %v950_v14, %v946_v6 }
 0x122   :  { %1420 = vmatpush.bf16.msrb.mxu1 %v1850_v26  ;;  %v927_v19 = vsel %vm926_vm14, %v2728_v55, %v923_v30  ;;  %1408 = vmatpush.bf16.msrb.mxu0 %v1770_v27  ;;  %v2126_v51 = vld [vmem:[#allocation8 + $0x184] sm:$0xf0]  ;;  %v2093_v20 = vld [vmem:[#allocation8 + $0x84] sm:$0xf]  ;;  %v1823_v17 = vld [vmem:[#allocation8 + $0x88] sm:$0xf0]  ;;  %v1938_v55 = vor.u32 %v2121_v63, %v1935_v15 }
 0x123   :  { %v932_v1 = vsel %vm929_vm15, %v931_v10, %v927_v19  ;;  %1393 = vmatpush.bf16.msra.mxu3 %v1966_v60  ;;  %v2139_v41 = vld [vmem:[#allocation8 + $0x1f4] sm:$0xf]  ;;  %v2007_v13 = vld [vmem:[#allocation8 + $0x1f8] sm:$0xf0]  ;;  %v939_v22 = vadd.f32 1.0, %v1750_v58  ;;  %v1950_v38 = vor.u32 %v2126_v51, %v1949_v43  ;;  %v1826_v31 = vor.u32 %v2093_v20, %v1823_v17 }
 0x124   :  { %v933_v0 = vmul.f32 %v932_v1, %v908_v9  ;;  %1381 = vmatpush.bf16.msra.mxu2 %v1886_v3  ;;  %v2119_v24 = vld [vmem:[#allocation8 + $0x154] sm:$0xf]  ;;  %v1927_v25 = vld [vmem:[#allocation8 + $0x158] sm:$0xf0]  ;;  %v603_v39 = vmul.f32 0.5, %v2495_v11  ;;  %v607_v32 = vmul.f32 0.5, %v2575_v7  ;;  %v2010_v57 = vor.u32 %v2139_v41, %v2007_v13 }
 0x125   :  { %v1930_v33 = vor.u32 %v2119_v24, %v1927_v25  ;;  %v2137_v26 = vld [vmem:[#allocation8 + $0x1e4] sm:$0xf]  ;;  %v1999_v35 = vld [vmem:[#allocation8 + $0x1e8] sm:$0xf0]  ;;  %v2135_v36 = vld [vmem:[#allocation8 + $0x1d4] sm:$0xf] }
 0x126   :  { %1421 = vmatpush.bf16.msrb.mxu1 %v1842_v8  ;;  %v1754_v23 = vclamps-f32 %v933_v0, 1.0  ;;  %1409 = vmatpush.bf16.msrb.mxu0 %v1762_v49  ;;  %v947_v18 = vmul.f32 %v939_v22, %v603_v39  ;;  %v2117_v28 = vld [vmem:[#allocation8 + $0x144] sm:$0xf]  ;;  %v1919_v21 = vld [vmem:[#allocation8 + $0x148] sm:$0xf0]  ;;  %v2002_v11 = vor.u32 %v2137_v26, %v1999_v35 }
 0x127   :  { %1394 = vmatpush.bf16.msra.mxu3 %v1958_v59  ;;  %1382 = vmatmul.bf16.vlgmr.msra.gmra.mxu2 %v2749_v29  ;;  %v1922_v7 = vor.u32 %v2117_v28, %v1919_v21  ;;  %v1991_v40 = vld [vmem:[#allocation8 + $0x1d8] sm:$0xf0]  ;;  %v2133_v34 = vld [vmem:[#allocation8 + $0x1c4] sm:$0xf]  ;;  %v1983_v46 = vld [vmem:[#allocation8 + $0x1c8] sm:$0xf0] }
 0x128   :  { %1430 = vmatpush.bf16.msrb.mxu2 %v1946_v12  ;;  %v943_v52 = vadd.f32 1.0, %v1754_v23  ;;  %v1911_v44 = vld [vmem:[#allocation8 + $0x138] sm:$0xf0]  ;;  %v1994_v45 = vor.u32 %v2135_v36, %v1991_v40  ;;  %v2113_v27 = vld [vmem:[#allocation8 + $0x124] sm:$0xf]  ;;  %v1986_v42 = vor.u32 %v2133_v34, %v1983_v46 }
 0x129   :  { %1410 = vmatmul.bf16.vlgmr.msrb.gmra.mxu0 %v2633_v48  ;;  %v2115_v48 = vld [vmem:[#allocation8 + $0x134] sm:$0xf]  ;;  %v1903_v56 = vld [vmem:[#allocation8 + $0x128] sm:$0xf0]  ;;  %v1975_v61 = vld [vmem:[#allocation8 + $0x1b8] sm:$0xf0] }
 0x12a   :  { %1422 = vmatpush.bf16.msrb.mxu1 %v1834_v37  ;;  %v951_v50 = vmul.f32 %v943_v52, %v607_v32  ;;  %v1914_v54 = vor.u32 %v2115_v48, %v1911_v44  ;;  %v1906_v60 = vor.u32 %v2113_v27, %v1903_v56  ;;  %v2131_v8 = vld [vmem:[#allocation8 + $0x1b4] sm:$0xf]  ;;  %v1895_v2 = vld [vmem:[#allocation8 + $0x118] sm:$0xf0]  ;;  %v2129_v30 = vld [vmem:[#allocation8 + $0x1a4] sm:$0xf] }
 0x12b   :  { %1395 = vmatpush.bf16.msra.mxu3 %v1950_v38  ;;  %v2111_v16 = vld [vmem:[#allocation8 + $0x114] sm:$0xf]  ;;  %v1967_v3 = vld [vmem:[#allocation8 + $0x1a8] sm:$0xf0]  ;;  %v2109_v62 = vld [vmem:[#allocation8 + $0x104] sm:$0xf] }
 0x12c   :  { %1431 = vmatpush.bf16.msrb.mxu2 %v1938_v55  ;;  %v955_v4 = vpack.c.bf16 %v951_v50, %v947_v18  ;;  %v1898_v14 = vor.u32 %v2111_v16, %v1895_v2  ;;  %v1887_v5 = vld [vmem:[#allocation8 + $0x108] sm:$0xf0]  ;;  %v1970_v47 = vor.u32 %v2129_v30, %v1967_v3  ;;  %v2127_v9 = vld [vmem:[#allocation8 + $0x194] sm:$0xf]  ;;  %v1959_v10 = vld [vmem:[#allocation8 + $0x198] sm:$0xf0] }
 0x12d   :  { %v1890_v6 = vor.u32 %v2109_v62, %v1887_v5  ;;  %v1962_v12 = vor.u32 %v2127_v9, %v1959_v10  ;;  %v2125_v58 = vld [vmem:[#allocation8 + $0x184] sm:$0xf]  ;;  %v1951_v19 = vld [vmem:[#allocation8 + $0x188] sm:$0xf0] }
 0x12e   :  { %1423 = vmatpush.bf16.msrb.mxu1 %v1826_v31  ;;  %1396 = vmatmul.bf16.vlgmr.msra.gmra.mxu3 %v955_v4  ;;  %v1954_v49 = vor.u32 %v2125_v58, %v1951_v19  ;;  %v1020_v63 = vld [vmem:[%s2770_s4] sm:$0x3]  ;;  %s2302_s4 = smov [#allocation10]  }
 0x12f   :  { %1444 = vmatpush.bf16.msrb.mxu3 %v2010_v57  ;;  %v1022_v1 = vperm.slane %v1020_v63, 0  ;;  %v1023_v31 = vperm.slane %v1020_v63, 1  ;;  %s1466_s15 = sshll.u32 %s2302_s4, 4  ;;  %s1467_s15 = int_to_ptr.vmem [resolvable:$true] %s1466_s15 }
 0x130   :  { %1432 = vmatpush.bf16.msrb.mxu2 %v1930_v33 }
 0x131   :  { %1424 = vmatmul.bf16.vlgmr.msrb.gmra.mxu1 %v2681_v53  ;;  %v1978_v53 = vor.u32 %v2131_v8, %v1975_v61 }
 0x133   :  { %1445 = vmatpush.bf16.msrb.mxu3 %v2002_v11 }
 0x134   :  { %1433 = vmatpush.bf16.msrb.mxu2 %v1922_v7 }
 0x137   :  { %1446 = vmatpush.bf16.msrb.mxu3 %v1994_v45 }
 0x138   :  { %1434 = vmatpush.bf16.msrb.mxu2 %v1914_v54 }
 0x13b   :  { %1447 = vmatpush.bf16.msrb.mxu3 %v1986_v42 }
 0x13c   :  { %1435 = vmatpush.bf16.msrb.mxu2 %v1906_v60 }
 0x13f   :  { %1448 = vmatpush.bf16.msrb.mxu3 %v1978_v53 }
 0x140   :  { %1436 = vmatpush.bf16.msrb.mxu2 %v1898_v14 }
 0x143   :  { %1449 = vmatpush.bf16.msrb.mxu3 %v1970_v47 }
 0x144   :  { %1437 = vmatpush.bf16.msrb.mxu2 %v1890_v6 }
 0x147   :  { %1450 = vmatpush.bf16.msrb.mxu3 %v1962_v12  ;;  %1438 = vmatmul.bf16.vlgmr.msrb.gmra.mxu2 %v2749_v29 }
 0x14b   :  { %1451 = vmatpush.bf16.msrb.mxu3 %v1954_v49 }
 0x14e   :  { %1452 = vmatmul.bf16.vlgmr.msrb.gmra.mxu3 %v955_v4 }
 0x183   :  { %v1355_v15 = vpop.f32.mrf.mxu0 }
 0x184   :  { %v1356_v43 = vadd.f32 %v1355_v15, %v1022_v1 }
 0x18b   :  { %v1357_v20 = vpop.f32.mrf.mxu0 }
 0x18c   :  { %v1358_v13 = vadd.f32 %v1357_v20, %v1022_v1 }
 0x18e   :  { %v1369_v59 = vpop.f32.mrf.mxu1 }
 0x18f   :  { %v1370_v0 = vadd.f32 %v1369_v59, %v1356_v43 }
 0x196   :  { %v1371_v41 = vpop.f32.mrf.mxu1 }
 0x197   :  { %v1372_v22 = vadd.f32 %v1371_v41, %v1358_v13 }
 0x1a6   :  { %v1411_v38 = vpop.f32.mrf.mxu0 }
 0x1a7   :  { %v1412_v52 = vadd.f32 %v1411_v38, %v1023_v31 }
 0x1aa   :  { %v1383_v37 = vpop.f32.mrf.mxu2 }
 0x1ab   :  { %v1384_v51 = vadd.f32 %v1383_v37, %v1370_v0 }
 0x1ae   :  { %v1425_v39 = vpop.f32.mrf.mxu1  ;;  %v1413_v26 = vpop.f32.mrf.mxu0 }
 0x1af   :  { %v1426_v57 = vadd.f32 %v1425_v39, %v1412_v52  ;;  %v1414_v28 = vadd.f32 %v1413_v26, %v1023_v31 }
 0x1b1   :  { %v1397_v17 = vpop.f32.mrf.mxu3 }
 0x1b2   :  { %v1398_v55 = vadd.f32 %v1397_v17, %v1384_v51  ;;  %v1385_v29 = vpop.f32.mrf.mxu2 }
 0x1b3   :  { %v1386_v23 = vadd.f32 %v1385_v29, %v1372_v22 }
 0x1b4   :  { %1458 = vst [vmem:[#allocation10] sm:$0xff] %v1398_v55 }
 0x1b6   :  { %v1427_v50 = vpop.f32.mrf.mxu1 }
 0x1b7   :  { %v1428_v4 = vadd.f32 %v1427_v50, %v1414_v28 }
 0x1b9   :  { %v1399_v24 = vpop.f32.mrf.mxu3 }
 0x1ba   :  { %v1400_v25 = vadd.f32 %v1399_v24, %v1386_v23 }
 0x1bc   :  { %1460 = vst [vmem:[#allocation10 + $0x10] sm:$0xff] %v1400_v25 }
 0x1ca   :  { %v1439_v32 = vpop.f32.mrf.mxu2 }
 0x1cb   :  { %v1440_v33 = vadd.f32 %v1439_v32, %v1426_v57 }
 0x1d1   :  { %v1453_v35 = vpop.f32.mrf.mxu3 }
 0x1d2   :  { %v1454_v18 = vadd.f32 %v1453_v35, %v1440_v33  ;;  %v1441_v21 = vpop.f32.mrf.mxu2 }
 0x1d3   :  { %v1442_v11 = vadd.f32 %v1441_v21, %v1428_v4 }
 0x1d4   :  { %1459 = vst [vmem:[#allocation10 + $0x8] sm:$0xff] %v1454_v18 }
 0x1d9   :  { %v1455_v7 = vpop.f32.mrf.mxu3 }
 0x1da   :  { %v1456_v36 = vadd.f32 %v1455_v7, %v1442_v11 }
 0x1dc   :  { %1461 = vst [vmem:[#allocation10 + $0x18] sm:$0xff] %v1456_v36 }
 0x1dd   :  { %1474 = dma.vmem_to_hbm [thread:$0]  %s1467_s15, 512, %s1469_s18, [#allocation4], %s2295_s26, %s2295_s26, %s2296_s27  }
 0x1de   :  { %2292 = dma.done.wait [#allocation4], 512  }
 0x1df   :  { %2293 = vsyncadd [#allocation4], 4294966784 }
 0x1e0   :  { %1479 = vsyncpa [#allocation3], 1 }
 0x1e1   :  { %1480 = vsyncpa [#allocation6], 1 }
 0x1e2   :  { %1481 = vsyncpa [#allocation9], 1 }
 0x1e3   :  { %1482 = vsyncpa [#allocation4], 1 }

</bundles_post_ra>
